<compile_context>
chip_gen: v7x
topology: tpu7x:2x2x1
jax: 0.10.0
libtpu: 0.0.40
codegen_flags: <defaults>
</compile_context>

<pallas_src>
import functools
import math

import jax
import jax.numpy as jnp
from jax.experimental import pallas as pl
from jax.experimental.pallas import tpu as pltpu

EPS = 1e-5    # BatchNorm eps (frozen BN with default running stats)
GAP = 128     # zero lanes before/after the flattened pixels (>= W+1, mult of 128)


# ----------------------------------------------------------------------------
# Pallas kernel: whole Inception3b forward, one image per grid step
# ----------------------------------------------------------------------------
def _inception3b_kernel(x_ref, wc1_ref, w3_ref, b_ref, out_ref, g_ref, *, H, W):
    HW = H * W

    # Lane-position masks: in the flattened (h*W + w) layout a +/-1 shift wraps
    # across image rows, so taps reading the left/right neighbour are zeroed at
    # w == 0 / w == W-1.  Masks are (1, HW) and broadcast over the 32 channels.
    col = jax.lax.broadcasted_iota(jnp.int32, (1, HW), 1)
    if (W & (W - 1)) == 0:
        wpos = jnp.bitwise_and(col, W - 1)
    else:
        wpos = col % W
    mask_l = wpos != 0          # taps with dj == 0 (read pixel to the left)
    mask_r = wpos != (W - 1)    # taps with dj == 2 (read pixel to the right)

    def conv3x3(row0, cout, bias):
        """3x3 'same' conv on the gapped channel-major scratch + bias + ReLU.

        Weights for tap t are w3_ref[t, row0:row0+cout, :]  (cout, 32) bf16.
        Returns (cout, HW) f32.
        """
        acc = jnp.zeros((cout, HW), jnp.float32)
        for di in range(3):
            for dj in range(3):
                tap = di * 3 + dj
                delta = (di - 1) * W + (dj - 1)
                win = g_ref[:, GAP + delta:GAP + delta + HW]      # (32, HW) bf16
                if dj == 0:
                    win = jnp.where(mask_l, win, jnp.zeros_like(win))
                elif dj == 2:
                    win = jnp.where(mask_r, win, jnp.zeros_like(win))
                w_tap = w3_ref[tap, row0:row0 + cout, :]          # (cout, 32) bf16
                acc = acc + jnp.dot(w_tap, win,
                                    preferred_element_type=jnp.float32)
        return jnp.maximum(acc + bias, 0.0)

    # ---- all three 1x1 ConvBn branches as one fused bf16 MXU matmul ---------
    xb = x_ref[0].astype(jnp.bfloat16)                            # (192, HW)
    y1 = jnp.dot(wc1_ref[...], xb, preferred_element_type=jnp.float32)
    y1 = jnp.maximum(y1 + b_ref[0:128, :], 0.0)                   # (128, HW) f32

    # right branch (branch31) goes straight to the output (lane-dense store),
    # freeing its (96, HW) live range before the 3x3 work.
    out_ref[0, 96:192, :] = y1[32:128, :].astype(out_ref.dtype)

    # ---- fused branch12 + branch22 (block-diagonal 3x3) on [t11; t21] -------
    # Zero only the two GAP strips (the middle HW lanes are fully overwritten).
    g_ref[:, 0:GAP] = jnp.zeros((32, GAP), jnp.bfloat16)
    g_ref[:, GAP + HW:GAP + HW + GAP] = jnp.zeros((32, GAP), jnp.bfloat16)
    g_ref[:, GAP:GAP + HW] = y1[0:32, :].astype(jnp.bfloat16)
    r = conv3x3(0, 96, b_ref[128:224, :])        # rows 0:32 = t12, 32:96 = mid
    out_ref[0, 32:96, :] = r[32:96, :].astype(out_ref.dtype)

    # ---- branch13 (3x3) on t12 ----------------------------------------------
    # GAP strips are still zero; only the middle is rewritten.
    g_ref[:, GAP:GAP + HW] = r[0:32, :].astype(jnp.bfloat16)
    left = conv3x3(96, 32, b_ref[224:256, :])
    out_ref[0, 0:32, :] = left.astype(out_ref.dtype)


# ----------------------------------------------------------------------------
# Wrapper: NCHW in -> NCHW (bf16) out, no transposes / casts outside the kernel
# ----------------------------------------------------------------------------
def inception3b_forward(params, x_nchw):
    N, C, H, W = x_nchw.shape
    assert C == 192 and GAP >= W + 1
    HW = H * W

    x = x_nchw.reshape(N, C, HW)     # pure view of NCHW (H,W stay contiguous)

    kernel = functools.partial(_inception3b_kernel, H=H, W=W)
    out = pl.pallas_call(
        kernel,
        out_shape=jax.ShapeDtypeStruct((N, 192, HW), jnp.bfloat16),
        grid=(N,),
        in_specs=[
            pl.BlockSpec((1, 192, HW), lambda n: (n, 0, 0)),   # x, one image
            pl.BlockSpec((128, 192), lambda n: (0, 0)),        # fused 1x1 weights
            pl.BlockSpec((9, 128, 32), lambda n: (0, 0, 0)),   # packed 3x3 weights
            pl.BlockSpec((256, 1), lambda n: (0, 0)),          # packed biases
        ],
        out_specs=pl.BlockSpec((1, 192, HW), lambda n: (n, 0, 0)),
        scratch_shapes=[
            pltpu.VMEM((32, 2 * GAP + HW), jnp.bfloat16),      # gapped feature map
        ],
        compiler_params=pltpu.CompilerParams(
            dimension_semantics=("parallel",),
        ),
    )(x, params['wc1'], params['w3'], params['b_all'])

    return out.reshape(N, 192, H, W)   # pure view, still channel-major NCHW


# ----------------------------------------------------------------------------
# Parameters (deterministic; frozen-BN scale folded into conv weights/biases)
# ----------------------------------------------------------------------------
def init_params(key):
    bn_scale = 1.0 / math.sqrt(1.0 + EPS)   # gamma=1, beta=0, mean=0, var=1
    ks = jax.random.split(key, 12)

    def conv_wb(kw, kb, k, cin, cout):
        fan_in = cin * k * k
        bound = 1.0 / math.sqrt(fan_in)
        if k == 1:
            w = jax.random.uniform(kw, (cout, cin), jnp.float32, -bound, bound)
        else:
            # (9, cout, cin): tap index t = di*3 + dj, matrix = W[:, :, di, dj]
            w = jax.random.uniform(kw, (9, cout, cin), jnp.float32, -bound, bound)
        b = jax.random.uniform(kb, (cout,), jnp.float32, -bound, bound)
        return w * bn_scale, b * bn_scale     # fold frozen BN

    w11, b11 = conv_wb(ks[0], ks[1], 1, 192, 16)
    w21, b21 = conv_wb(ks[2], ks[3], 1, 192, 16)
    w31, b31 = conv_wb(ks[4], ks[5], 1, 192, 96)
    w12, b12 = conv_wb(ks[6], ks[7], 3, 16, 32)
    w13, b13 = conv_wb(ks[8], ks[9], 3, 32, 32)
    w22, b22 = conv_wb(ks[10], ks[11], 3, 16, 64)

    # Fused 1x1 weight, channel-major (cout=128, cin=192): rows 0:16 branch11,
    # 16:32 branch21, 32:128 branch31.
    wc1 = jnp.concatenate([w11, w21, w31], axis=0)

    # Packed 3x3 weights (9, 128, 32):
    #   rows 0:96  = block-diagonal fusion of branch12 (cin 0:16) + branch22
    #                (cin 16:32)
    #   rows 96:128 = branch13 (cin = all 32 channels of t12)
    w3 = jnp.zeros((9, 128, 32), jnp.float32)
    w3 = w3.at[:, 0:32, 0:16].set(w12)
    w3 = w3.at[:, 32:96, 16:32].set(w22)
    w3 = w3.at[:, 96:128, :].set(w13)

    # Packed biases (256, 1): [b11|b21|b31 | b12|b22 | b13]
    b_all = jnp.concatenate([b11, b21, b31, b12, b22, b13]).reshape(256, 1)

    return {
        'wc1': wc1.astype(jnp.bfloat16),
        'w3': w3.astype(jnp.bfloat16),
        'b_all': b_all,
    }


# ----------------------------------------------------------------------------
# Plain-JAX reference (same frozen-BN folding and bf16 quantisation points)
# ----------------------------------------------------------------------------
def _reference(params, x_nchw):
    f32 = jnp.float32
    x = x_nchw.astype(jnp.bfloat16).astype(f32)
    wc1 = params['wc1'].astype(f32)               # (128, 192)
    w3 = params['w3'].astype(f32)                 # (9, 128, 32)
    b = params['b_all'][:, 0]                     # (256,)

    y1 = jax.nn.relu(jnp.einsum('oc,nchw->nohw', wc1, x)
                     + b[:128][None, :, None, None])
    t = y1[:, 0:32].astype(jnp.bfloat16).astype(f32)   # [t11; t21], bf16 like kernel
    right = y1[:, 32:128]

    def conv3(inp, w9, bias):                     # inp (N,cin,H,W), w9 (9,cout,cin)
        cout = w9.shape[1]
        w = w9.reshape(3, 3, cout, -1).transpose(2, 3, 0, 1)   # OIHW
        y = jax.lax.conv_general_dilated(
            inp, w, (1, 1), 'SAME',
            dimension_numbers=('NCHW', 'OIHW', 'NCHW'))
        return jax.nn.relu(y + bias[None, :, None, None])

    # fused branch12 + branch22 (block-diagonal weights), then branch13
    r = conv3(t, w3[:, 0:96, :], b[128:224])
    t12 = r[:, 0:32].astype(jnp.bfloat16).astype(f32)
    mid = r[:, 32:96]
    left = conv3(t12, w3[:, 96:128, :], b[224:256])

    out = jnp.concatenate([left, mid, right], axis=1)
    return out.astype(jnp.bfloat16)


if __name__ == "__main__":
    key = jax.random.PRNGKey(0)
    pkey, xkey = jax.random.split(key)
    params = init_params(pkey)
    img = jax.random.normal(xkey, (2, 192, 16, 16), jnp.float32)   # NCHW

    out = jax.jit(inception3b_forward)(params, img)
    out = jax.block_until_ready(out)

    assert out.shape == (2, 192, 16, 16), out.shape
    assert out.dtype == jnp.bfloat16, out.dtype
    assert bool(jnp.all(jnp.isfinite(out.astype(jnp.float32))))

    ref = _reference(params, img)
    max_err = float(jnp.max(jnp.abs(out.astype(jnp.float32) -
                                    ref.astype(jnp.float32))))
    assert max_err < 5e-2, f"max abs error vs reference: {max_err}"

    print("KERNEL_OK")
</pallas_src>

<mosaic_0001>
module attributes {stable_mosaic.version = 11 : i64} {
  func.func @_inception3b_kernel(%arg0: i32, %arg1: memref<1x192x256xf32, #tpu.memory_space<vmem>>, %arg2: memref<128x192xbf16, #tpu.memory_space<vmem>>, %arg3: memref<9x128x32xbf16, #tpu.memory_space<vmem>>, %arg4: memref<256x1xf32, #tpu.memory_space<vmem>>, %arg5: memref<1x192x256xbf16, #tpu.memory_space<vmem>>, %arg6: memref<32x512xbf16, #tpu.memory_space<vmem>>) attributes {dimension_semantics = [#tpu.dimension_semantics<parallel>], iteration_bounds = array<i64: 2>, scalar_prefetch = 0 : i64, scratch_operands = 1 : i64, tpu.core_type = #tpu.core_type<tc>, window_params = [{transform_indices = @transform_0, window_bounds = array<i64: 1, 192, 256>}, {pipeline_mode = #tpu.pipeline_mode<synchronous>, transform_indices = @transform_1, window_bounds = array<i64: 128, 192>}, {pipeline_mode = #tpu.pipeline_mode<synchronous>, transform_indices = @transform_2, window_bounds = array<i64: 9, 128, 32>}, {pipeline_mode = #tpu.pipeline_mode<synchronous>, transform_indices = @transform_3, window_bounds = array<i64: 256, 1>}, {transform_indices = @transform_4, window_bounds = array<i64: 1, 192, 256>}]} {
    %0 = tpu.iota {dimensions = array<i32: 1>} : vector<1x256xi32>
    %c15_i32 = arith.constant 15 : i32
    %1 = vector.broadcast %c15_i32 : i32 to vector<1x256xi32>
    %2 = arith.andi %0, %1 : vector<1x256xi32>
    %c0_i32 = arith.constant 0 : i32
    %3 = vector.broadcast %c0_i32 : i32 to vector<1x256xi32>
    %4 = arith.cmpi ne, %2, %3 : vector<1x256xi32>
    %c15_i32_0 = arith.constant 15 : i32
    %5 = vector.broadcast %c15_i32_0 : i32 to vector<1x256xi32>
    %6 = arith.cmpi ne, %2, %5 : vector<1x256xi32>
    %c0 = arith.constant 0 : index
    %c0_1 = arith.constant 0 : index
    %c0_2 = arith.constant 0 : index
    %7 = vector.load %arg1[%c0, %c0_1, %c0_2] : memref<1x192x256xf32, #tpu.memory_space<vmem>>, vector<1x192x256xf32>
    %8 = vector.shape_cast %7 : vector<1x192x256xf32> to vector<192x256xf32>
    %9 = arith.truncf %8 : vector<192x256xf32> to vector<192x256xbf16>
    %c0_3 = arith.constant 0 : index
    %c0_4 = arith.constant 0 : index
    %10 = vector.load %arg2[%c0_3, %c0_4] : memref<128x192xbf16, #tpu.memory_space<vmem>>, vector<128x192xbf16>
    %cst = arith.constant dense<0.000000e+00> : vector<128x256xf32>
    %11 = tpu.matmul %10, %9, %cst {dimension_numbers = #tpu.dot_dimension_numbers<[1], [0], [0], [1], [0, 0, 1, 1], [], []>} : vector<128x192xbf16>, vector<192x256xbf16>, vector<128x256xf32> -> vector<128x256xf32>
    %c0_5 = arith.constant 0 : index
    %c0_6 = arith.constant 0 : index
    %12 = vector.load %arg4[%c0_5, %c0_6] : memref<256x1xf32, #tpu.memory_space<vmem>>, vector<128x1xf32>
    %13 = vector.broadcast %12 : vector<128x1xf32> to vector<128x256xf32>
    %14 = arith.addf %11, %13 : vector<128x256xf32>
    %cst_7 = arith.constant 0.000000e+00 : f32
    %15 = vector.broadcast %cst_7 : f32 to vector<128x256xf32>
    %16 = arith.maximumf %14, %15 : vector<128x256xf32>
    %17 = vector.extract_strided_slice %16 {offsets = [32, 0], sizes = [96, 256], strides = [1, 1]} : vector<128x256xf32> to vector<96x256xf32>
    %18 = arith.truncf %17 : vector<96x256xf32> to vector<96x256xbf16>
    %c0_8 = arith.constant 0 : index
    %c96 = arith.constant 96 : index
    %c0_9 = arith.constant 0 : index
    %19 = vector.load %arg5[%c0_8, %c96, %c0_9] : memref<1x192x256xbf16, #tpu.memory_space<vmem>>, vector<1x96x256xbf16>
    %20 = vector.shape_cast %19 : vector<1x96x256xbf16> to vector<96x256xbf16>
    %21 = vector.shape_cast %18 : vector<96x256xbf16> to vector<1x96x256xbf16>
    tpu.vector_store %arg5[%c0_8, %c96, %c0_9], %21 {strides = array<i32>} : memref<1x192x256xbf16, #tpu.memory_space<vmem>>, vector<1x96x256xbf16>,
    %cst_10 = arith.constant 0.000000e+00 : bf16
    %22 = vector.broadcast %cst_10 : bf16 to vector<32x128xbf16>
    %c0_11 = arith.constant 0 : index
    %c0_12 = arith.constant 0 : index
    %23 = vector.load %arg6[%c0_11, %c0_12] : memref<32x512xbf16, #tpu.memory_space<vmem>>, vector<32x128xbf16>
    tpu.vector_store %arg6[%c0_11, %c0_12], %22 {strides = array<i32>} : memref<32x512xbf16, #tpu.memory_space<vmem>>, vector<32x128xbf16>,
    %cst_13 = arith.constant 0.000000e+00 : bf16
    %24 = vector.broadcast %cst_13 : bf16 to vector<32x128xbf16>
    %c0_14 = arith.constant 0 : index
    %c384 = arith.constant 384 : index
    %25 = vector.load %arg6[%c0_14, %c384] : memref<32x512xbf16, #tpu.memory_space<vmem>>, vector<32x128xbf16>
    tpu.vector_store %arg6[%c0_14, %c384], %24 {strides = array<i32>} : memref<32x512xbf16, #tpu.memory_space<vmem>>, vector<32x128xbf16>,
    %26 = vector.extract_strided_slice %16 {offsets = [0, 0], sizes = [32, 256], strides = [1, 1]} : vector<128x256xf32> to vector<32x256xf32>
    %27 = arith.truncf %26 : vector<32x256xf32> to vector<32x256xbf16>
    %c0_15 = arith.constant 0 : index
    %c128 = arith.constant 128 : index
    %28 = vector.load %arg6[%c0_15, %c128] : memref<32x512xbf16, #tpu.memory_space<vmem>>, vector<32x256xbf16>
    tpu.vector_store %arg6[%c0_15, %c128], %27 {strides = array<i32>} : memref<32x512xbf16, #tpu.memory_space<vmem>>, vector<32x256xbf16>,
    %c128_16 = arith.constant 128 : index
    %c0_17 = arith.constant 0 : index
    %29 = vector.load %arg4[%c128_16, %c0_17] : memref<256x1xf32, #tpu.memory_space<vmem>>, vector<96x1xf32>
    %cst_18 = arith.constant 0.000000e+00 : f32
    %30 = vector.broadcast %cst_18 : f32 to vector<96x256xf32>
    %c0_19 = arith.constant 0 : index
    %c111 = arith.constant 111 : index
    %31 = vector.load %arg6[%c0_19, %c111] : memref<32x512xbf16, #tpu.memory_space<vmem>>, vector<32x256xbf16>
    %cst_20 = arith.constant 0.000000e+00 : bf16
    %32 = vector.broadcast %cst_20 : bf16 to vector<32x256xbf16>
    %33 = vector.shape_cast %4 : vector<1x256xi1> to vector<1x256xi1>
    %34 = vector.broadcast %33 : vector<1x256xi1> to vector<32x256xi1>
    %35 = arith.select %34, %31, %32 : vector<32x256xi1>, vector<32x256xbf16>
    %c0_21 = arith.constant 0 : index
    %c0_22 = arith.constant 0 : index
    %c0_23 = arith.constant 0 : index
    %36 = vector.load %arg3[%c0_21, %c0_22, %c0_23] : memref<9x128x32xbf16, #tpu.memory_space<vmem>>, vector<1x96x32xbf16>
    %37 = vector.shape_cast %36 : vector<1x96x32xbf16> to vector<96x32xbf16>
    %cst_24 = arith.constant dense<0.000000e+00> : vector<96x256xf32>
    %38 = tpu.matmul %37, %35, %cst_24 {dimension_numbers = #tpu.dot_dimension_numbers<[1], [0], [0], [1], [0, 0, 1, 1], [], []>} : vector<96x32xbf16>, vector<32x256xbf16>, vector<96x256xf32> -> vector<96x256xf32>
    %39 = arith.addf %30, %38 : vector<96x256xf32>
    %c0_25 = arith.constant 0 : index
    %c112 = arith.constant 112 : index
    %40 = vector.load %arg6[%c0_25, %c112] : memref<32x512xbf16, #tpu.memory_space<vmem>>, vector<32x256xbf16>
    %c1 = arith.constant 1 : index
    %c0_26 = arith.constant 0 : index
    %c0_27 = arith.constant 0 : index
    %41 = vector.load %arg3[%c1, %c0_26, %c0_27] : memref<9x128x32xbf16, #tpu.memory_space<vmem>>, vector<1x96x32xbf16>
    %42 = vector.shape_cast %41 : vector<1x96x32xbf16> to vector<96x32xbf16>
    %cst_28 = arith.constant dense<0.000000e+00> : vector<96x256xf32>
    %43 = tpu.matmul %42, %40, %cst_28 {dimension_numbers = #tpu.dot_dimension_numbers<[1], [0], [0], [1], [0, 0, 1, 1], [], []>} : vector<96x32xbf16>, vector<32x256xbf16>, vector<96x256xf32> -> vector<96x256xf32>
    %44 = arith.addf %39, %43 : vector<96x256xf32>
    %c0_29 = arith.constant 0 : index
    %c113 = arith.constant 113 : index
    %45 = vector.load %arg6[%c0_29, %c113] : memref<32x512xbf16, #tpu.memory_space<vmem>>, vector<32x256xbf16>
    %cst_30 = arith.constant 0.000000e+00 : bf16
    %46 = vector.broadcast %cst_30 : bf16 to vector<32x256xbf16>
    %47 = vector.shape_cast %6 : vector<1x256xi1> to vector<1x256xi1>
    %48 = vector.broadcast %47 : vector<1x256xi1> to vector<32x256xi1>
    %49 = arith.select %48, %45, %46 : vector<32x256xi1>, vector<32x256xbf16>
    %c2 = arith.constant 2 : index
    %c0_31 = arith.constant 0 : index
    %c0_32 = arith.constant 0 : index
    %50 = vector.load %arg3[%c2, %c0_31, %c0_32] : memref<9x128x32xbf16, #tpu.memory_space<vmem>>, vector<1x96x32xbf16>
    %51 = vector.shape_cast %50 : vector<1x96x32xbf16> to vector<96x32xbf16>
    %cst_33 = arith.constant dense<0.000000e+00> : vector<96x256xf32>
    %52 = tpu.matmul %51, %49, %cst_33 {dimension_numbers = #tpu.dot_dimension_numbers<[1], [0], [0], [1], [0, 0, 1, 1], [], []>} : vector<96x32xbf16>, vector<32x256xbf16>, vector<96x256xf32> -> vector<96x256xf32>
    %53 = arith.addf %44, %52 : vector<96x256xf32>
    %c0_34 = arith.constant 0 : index
    %c127 = arith.constant 127 : index
    %54 = vector.load %arg6[%c0_34, %c127] : memref<32x512xbf16, #tpu.memory_space<vmem>>, vector<32x256xbf16>
    %cst_35 = arith.constant 0.000000e+00 : bf16
    %55 = vector.broadcast %cst_35 : bf16 to vector<32x256xbf16>
    %56 = vector.shape_cast %4 : vector<1x256xi1> to vector<1x256xi1>
    %57 = vector.broadcast %56 : vector<1x256xi1> to vector<32x256xi1>
    %58 = arith.select %57, %54, %55 : vector<32x256xi1>, vector<32x256xbf16>
    %c3 = arith.constant 3 : index
    %c0_36 = arith.constant 0 : index
    %c0_37 = arith.constant 0 : index
    %59 = vector.load %arg3[%c3, %c0_36, %c0_37] : memref<9x128x32xbf16, #tpu.memory_space<vmem>>, vector<1x96x32xbf16>
    %60 = vector.shape_cast %59 : vector<1x96x32xbf16> to vector<96x32xbf16>
    %cst_38 = arith.constant dense<0.000000e+00> : vector<96x256xf32>
    %61 = tpu.matmul %60, %58, %cst_38 {dimension_numbers = #tpu.dot_dimension_numbers<[1], [0], [0], [1], [0, 0, 1, 1], [], []>} : vector<96x32xbf16>, vector<32x256xbf16>, vector<96x256xf32> -> vector<96x256xf32>
    %62 = arith.addf %53, %61 : vector<96x256xf32>
    %c0_39 = arith.constant 0 : index
    %c128_40 = arith.constant 128 : index
    %63 = vector.load %arg6[%c0_39, %c128_40] : memref<32x512xbf16, #tpu.memory_space<vmem>>, vector<32x256xbf16>
    %c4 = arith.constant 4 : index
    %c0_41 = arith.constant 0 : index
    %c0_42 = arith.constant 0 : index
    %64 = vector.load %arg3[%c4, %c0_41, %c0_42] : memref<9x128x32xbf16, #tpu.memory_space<vmem>>, vector<1x96x32xbf16>
    %65 = vector.shape_cast %64 : vector<1x96x32xbf16> to vector<96x32xbf16>
    %cst_43 = arith.constant dense<0.000000e+00> : vector<96x256xf32>
    %66 = tpu.matmul %65, %63, %cst_43 {dimension_numbers = #tpu.dot_dimension_numbers<[1], [0], [0], [1], [0, 0, 1, 1], [], []>} : vector<96x32xbf16>, vector<32x256xbf16>, vector<96x256xf32> -> vector<96x256xf32>
    %67 = arith.addf %62, %66 : vector<96x256xf32>
    %c0_44 = arith.constant 0 : index
    %c129 = arith.constant 129 : index
    %68 = vector.load %arg6[%c0_44, %c129] : memref<32x512xbf16, #tpu.memory_space<vmem>>, vector<32x256xbf16>
    %cst_45 = arith.constant 0.000000e+00 : bf16
    %69 = vector.broadcast %cst_45 : bf16 to vector<32x256xbf16>
    %70 = vector.shape_cast %6 : vector<1x256xi1> to vector<1x256xi1>
    %71 = vector.broadcast %70 : vector<1x256xi1> to vector<32x256xi1>
    %72 = arith.select %71, %68, %69 : vector<32x256xi1>, vector<32x256xbf16>
    %c5 = arith.constant 5 : index
    %c0_46 = arith.constant 0 : index
    %c0_47 = arith.constant 0 : index
    %73 = vector.load %arg3[%c5, %c0_46, %c0_47] : memref<9x128x32xbf16, #tpu.memory_space<vmem>>, vector<1x96x32xbf16>
    %74 = vector.shape_cast %73 : vector<1x96x32xbf16> to vector<96x32xbf16>
    %cst_48 = arith.constant dense<0.000000e+00> : vector<96x256xf32>
    %75 = tpu.matmul %74, %72, %cst_48 {dimension_numbers = #tpu.dot_dimension_numbers<[1], [0], [0], [1], [0, 0, 1, 1], [], []>} : vector<96x32xbf16>, vector<32x256xbf16>, vector<96x256xf32> -> vector<96x256xf32>
    %76 = arith.addf %67, %75 : vector<96x256xf32>
    %c0_49 = arith.constant 0 : index
    %c143 = arith.constant 143 : index
    %77 = vector.load %arg6[%c0_49, %c143] : memref<32x512xbf16, #tpu.memory_space<vmem>>, vector<32x256xbf16>
    %cst_50 = arith.constant 0.000000e+00 : bf16
    %78 = vector.broadcast %cst_50 : bf16 to vector<32x256xbf16>
    %79 = vector.shape_cast %4 : vector<1x256xi1> to vector<1x256xi1>
    %80 = vector.broadcast %79 : vector<1x256xi1> to vector<32x256xi1>
    %81 = arith.select %80, %77, %78 : vector<32x256xi1>, vector<32x256xbf16>
    %c6 = arith.constant 6 : index
    %c0_51 = arith.constant 0 : index
    %c0_52 = arith.constant 0 : index
    %82 = vector.load %arg3[%c6, %c0_51, %c0_52] : memref<9x128x32xbf16, #tpu.memory_space<vmem>>, vector<1x96x32xbf16>
    %83 = vector.shape_cast %82 : vector<1x96x32xbf16> to vector<96x32xbf16>
    %cst_53 = arith.constant dense<0.000000e+00> : vector<96x256xf32>
    %84 = tpu.matmul %83, %81, %cst_53 {dimension_numbers = #tpu.dot_dimension_numbers<[1], [0], [0], [1], [0, 0, 1, 1], [], []>} : vector<96x32xbf16>, vector<32x256xbf16>, vector<96x256xf32> -> vector<96x256xf32>
    %85 = arith.addf %76, %84 : vector<96x256xf32>
    %c0_54 = arith.constant 0 : index
    %c144 = arith.constant 144 : index
    %86 = vector.load %arg6[%c0_54, %c144] : memref<32x512xbf16, #tpu.memory_space<vmem>>, vector<32x256xbf16>
    %c7 = arith.constant 7 : index
    %c0_55 = arith.constant 0 : index
    %c0_56 = arith.constant 0 : index
    %87 = vector.load %arg3[%c7, %c0_55, %c0_56] : memref<9x128x32xbf16, #tpu.memory_space<vmem>>, vector<1x96x32xbf16>
    %88 = vector.shape_cast %87 : vector<1x96x32xbf16> to vector<96x32xbf16>
    %cst_57 = arith.constant dense<0.000000e+00> : vector<96x256xf32>
    %89 = tpu.matmul %88, %86, %cst_57 {dimension_numbers = #tpu.dot_dimension_numbers<[1], [0], [0], [1], [0, 0, 1, 1], [], []>} : vector<96x32xbf16>, vector<32x256xbf16>, vector<96x256xf32> -> vector<96x256xf32>
    %90 = arith.addf %85, %89 : vector<96x256xf32>
    %c0_58 = arith.constant 0 : index
    %c145 = arith.constant 145 : index
    %91 = vector.load %arg6[%c0_58, %c145] : memref<32x512xbf16, #tpu.memory_space<vmem>>, vector<32x256xbf16>
    %cst_59 = arith.constant 0.000000e+00 : bf16
    %92 = vector.broadcast %cst_59 : bf16 to vector<32x256xbf16>
    %93 = vector.shape_cast %6 : vector<1x256xi1> to vector<1x256xi1>
    %94 = vector.broadcast %93 : vector<1x256xi1> to vector<32x256xi1>
    %95 = arith.select %94, %91, %92 : vector<32x256xi1>, vector<32x256xbf16>
    %c8 = arith.constant 8 : index
    %c0_60 = arith.constant 0 : index
    %c0_61 = arith.constant 0 : index
    %96 = vector.load %arg3[%c8, %c0_60, %c0_61] : memref<9x128x32xbf16, #tpu.memory_space<vmem>>, vector<1x96x32xbf16>
    %97 = vector.shape_cast %96 : vector<1x96x32xbf16> to vector<96x32xbf16>
    %cst_62 = arith.constant dense<0.000000e+00> : vector<96x256xf32>
    %98 = tpu.matmul %97, %95, %cst_62 {dimension_numbers = #tpu.dot_dimension_numbers<[1], [0], [0], [1], [0, 0, 1, 1], [], []>} : vector<96x32xbf16>, vector<32x256xbf16>, vector<96x256xf32> -> vector<96x256xf32>
    %99 = arith.addf %90, %98 : vector<96x256xf32>
    %100 = vector.broadcast %29 : vector<96x1xf32> to vector<96x256xf32>
    %101 = arith.addf %99, %100 : vector<96x256xf32>
    %cst_63 = arith.constant 0.000000e+00 : f32
    %102 = vector.broadcast %cst_63 : f32 to vector<96x256xf32>
    %103 = arith.maximumf %101, %102 : vector<96x256xf32>
    %104 = vector.extract_strided_slice %103 {offsets = [32, 0], sizes = [64, 256], strides = [1, 1]} : vector<96x256xf32> to vector<64x256xf32>
    %105 = arith.truncf %104 : vector<64x256xf32> to vector<64x256xbf16>
    %c0_64 = arith.constant 0 : index
    %c32 = arith.constant 32 : index
    %c0_65 = arith.constant 0 : index
    %106 = vector.load %arg5[%c0_64, %c32, %c0_65] : memref<1x192x256xbf16, #tpu.memory_space<vmem>>, vector<1x64x256xbf16>
    %107 = vector.shape_cast %106 : vector<1x64x256xbf16> to vector<64x256xbf16>
    %108 = vector.shape_cast %105 : vector<64x256xbf16> to vector<1x64x256xbf16>
    tpu.vector_store %arg5[%c0_64, %c32, %c0_65], %108 {strides = array<i32>} : memref<1x192x256xbf16, #tpu.memory_space<vmem>>, vector<1x64x256xbf16>,
    %109 = vector.extract_strided_slice %103 {offsets = [0, 0], sizes = [32, 256], strides = [1, 1]} : vector<96x256xf32> to vector<32x256xf32>
    %110 = arith.truncf %109 : vector<32x256xf32> to vector<32x256xbf16>
    %c0_66 = arith.constant 0 : index
    %c128_67 = arith.constant 128 : index
    %111 = vector.load %arg6[%c0_66, %c128_67] : memref<32x512xbf16, #tpu.memory_space<vmem>>, vector<32x256xbf16>
    tpu.vector_store %arg6[%c0_66, %c128_67], %110 {strides = array<i32>} : memref<32x512xbf16, #tpu.memory_space<vmem>>, vector<32x256xbf16>,
    %c224 = arith.constant 224 : index
    %c0_68 = arith.constant 0 : index
    %112 = vector.load %arg4[%c224, %c0_68] : memref<256x1xf32, #tpu.memory_space<vmem>>, vector<32x1xf32>
    %cst_69 = arith.constant 0.000000e+00 : f32
    %113 = vector.broadcast %cst_69 : f32 to vector<32x256xf32>
    %c0_70 = arith.constant 0 : index
    %c111_71 = arith.constant 111 : index
    %114 = vector.load %arg6[%c0_70, %c111_71] : memref<32x512xbf16, #tpu.memory_space<vmem>>, vector<32x256xbf16>
    %cst_72 = arith.constant 0.000000e+00 : bf16
    %115 = vector.broadcast %cst_72 : bf16 to vector<32x256xbf16>
    %116 = vector.shape_cast %4 : vector<1x256xi1> to vector<1x256xi1>
    %117 = vector.broadcast %116 : vector<1x256xi1> to vector<32x256xi1>
    %118 = arith.select %117, %114, %115 : vector<32x256xi1>, vector<32x256xbf16>
    %c0_73 = arith.constant 0 : index
    %c96_74 = arith.constant 96 : index
    %c0_75 = arith.constant 0 : index
    %119 = vector.load %arg3[%c0_73, %c96_74, %c0_75] : memref<9x128x32xbf16, #tpu.memory_space<vmem>>, vector<1x32x32xbf16>
    %120 = vector.shape_cast %119 : vector<1x32x32xbf16> to vector<32x32xbf16>
    %cst_76 = arith.constant dense<0.000000e+00> : vector<32x256xf32>
    %121 = tpu.matmul %120, %118, %cst_76 {dimension_numbers = #tpu.dot_dimension_numbers<[1], [0], [0], [1], [0, 0, 1, 1], [], []>} : vector<32x32xbf16>, vector<32x256xbf16>, vector<32x256xf32> -> vector<32x256xf32>
    %122 = arith.addf %113, %121 : vector<32x256xf32>
    %c0_77 = arith.constant 0 : index
    %c112_78 = arith.constant 112 : index
    %123 = vector.load %arg6[%c0_77, %c112_78] : memref<32x512xbf16, #tpu.memory_space<vmem>>, vector<32x256xbf16>
    %c1_79 = arith.constant 1 : index
    %c96_80 = arith.constant 96 : index
    %c0_81 = arith.constant 0 : index
    %124 = vector.load %arg3[%c1_79, %c96_80, %c0_81] : memref<9x128x32xbf16, #tpu.memory_space<vmem>>, vector<1x32x32xbf16>
    %125 = vector.shape_cast %124 : vector<1x32x32xbf16> to vector<32x32xbf16>
    %cst_82 = arith.constant dense<0.000000e+00> : vector<32x256xf32>
    %126 = tpu.matmul %125, %123, %cst_82 {dimension_numbers = #tpu.dot_dimension_numbers<[1], [0], [0], [1], [0, 0, 1, 1], [], []>} : vector<32x32xbf16>, vector<32x256xbf16>, vector<32x256xf32> -> vector<32x256xf32>
    %127 = arith.addf %122, %126 : vector<32x256xf32>
    %c0_83 = arith.constant 0 : index
    %c113_84 = arith.constant 113 : index
    %128 = vector.load %arg6[%c0_83, %c113_84] : memref<32x512xbf16, #tpu.memory_space<vmem>>, vector<32x256xbf16>
    %cst_85 = arith.constant 0.000000e+00 : bf16
    %129 = vector.broadcast %cst_85 : bf16 to vector<32x256xbf16>
    %130 = vector.shape_cast %6 : vector<1x256xi1> to vector<1x256xi1>
    %131 = vector.broadcast %130 : vector<1x256xi1> to vector<32x256xi1>
    %132 = arith.select %131, %128, %129 : vector<32x256xi1>, vector<32x256xbf16>
    %c2_86 = arith.constant 2 : index
    %c96_87 = arith.constant 96 : index
    %c0_88 = arith.constant 0 : index
    %133 = vector.load %arg3[%c2_86, %c96_87, %c0_88] : memref<9x128x32xbf16, #tpu.memory_space<vmem>>, vector<1x32x32xbf16>
    %134 = vector.shape_cast %133 : vector<1x32x32xbf16> to vector<32x32xbf16>
    %cst_89 = arith.constant dense<0.000000e+00> : vector<32x256xf32>
    %135 = tpu.matmul %134, %132, %cst_89 {dimension_numbers = #tpu.dot_dimension_numbers<[1], [0], [0], [1], [0, 0, 1, 1], [], []>} : vector<32x32xbf16>, vector<32x256xbf16>, vector<32x256xf32> -> vector<32x256xf32>
    %136 = arith.addf %127, %135 : vector<32x256xf32>
    %c0_90 = arith.constant 0 : index
    %c127_91 = arith.constant 127 : index
    %137 = vector.load %arg6[%c0_90, %c127_91] : memref<32x512xbf16, #tpu.memory_space<vmem>>, vector<32x256xbf16>
    %cst_92 = arith.constant 0.000000e+00 : bf16
    %138 = vector.broadcast %cst_92 : bf16 to vector<32x256xbf16>
    %139 = vector.shape_cast %4 : vector<1x256xi1> to vector<1x256xi1>
    %140 = vector.broadcast %139 : vector<1x256xi1> to vector<32x256xi1>
    %141 = arith.select %140, %137, %138 : vector<32x256xi1>, vector<32x256xbf16>
    %c3_93 = arith.constant 3 : index
    %c96_94 = arith.constant 96 : index
    %c0_95 = arith.constant 0 : index
    %142 = vector.load %arg3[%c3_93, %c96_94, %c0_95] : memref<9x128x32xbf16, #tpu.memory_space<vmem>>, vector<1x32x32xbf16>
    %143 = vector.shape_cast %142 : vector<1x32x32xbf16> to vector<32x32xbf16>
    %cst_96 = arith.constant dense<0.000000e+00> : vector<32x256xf32>
    %144 = tpu.matmul %143, %141, %cst_96 {dimension_numbers = #tpu.dot_dimension_numbers<[1], [0], [0], [1], [0, 0, 1, 1], [], []>} : vector<32x32xbf16>, vector<32x256xbf16>, vector<32x256xf32> -> vector<32x256xf32>
    %145 = arith.addf %136, %144 : vector<32x256xf32>
    %c0_97 = arith.constant 0 : index
    %c128_98 = arith.constant 128 : index
    %146 = vector.load %arg6[%c0_97, %c128_98] : memref<32x512xbf16, #tpu.memory_space<vmem>>, vector<32x256xbf16>
    %c4_99 = arith.constant 4 : index
    %c96_100 = arith.constant 96 : index
    %c0_101 = arith.constant 0 : index
    %147 = vector.load %arg3[%c4_99, %c96_100, %c0_101] : memref<9x128x32xbf16, #tpu.memory_space<vmem>>, vector<1x32x32xbf16>
    %148 = vector.shape_cast %147 : vector<1x32x32xbf16> to vector<32x32xbf16>
    %cst_102 = arith.constant dense<0.000000e+00> : vector<32x256xf32>
    %149 = tpu.matmul %148, %146, %cst_102 {dimension_numbers = #tpu.dot_dimension_numbers<[1], [0], [0], [1], [0, 0, 1, 1], [], []>} : vector<32x32xbf16>, vector<32x256xbf16>, vector<32x256xf32> -> vector<32x256xf32>
    %150 = arith.addf %145, %149 : vector<32x256xf32>
    %c0_103 = arith.constant 0 : index
    %c129_104 = arith.constant 129 : index
    %151 = vector.load %arg6[%c0_103, %c129_104] : memref<32x512xbf16, #tpu.memory_space<vmem>>, vector<32x256xbf16>
    %cst_105 = arith.constant 0.000000e+00 : bf16
    %152 = vector.broadcast %cst_105 : bf16 to vector<32x256xbf16>
    %153 = vector.shape_cast %6 : vector<1x256xi1> to vector<1x256xi1>
    %154 = vector.broadcast %153 : vector<1x256xi1> to vector<32x256xi1>
    %155 = arith.select %154, %151, %152 : vector<32x256xi1>, vector<32x256xbf16>
    %c5_106 = arith.constant 5 : index
    %c96_107 = arith.constant 96 : index
    %c0_108 = arith.constant 0 : index
    %156 = vector.load %arg3[%c5_106, %c96_107, %c0_108] : memref<9x128x32xbf16, #tpu.memory_space<vmem>>, vector<1x32x32xbf16>
    %157 = vector.shape_cast %156 : vector<1x32x32xbf16> to vector<32x32xbf16>
    %cst_109 = arith.constant dense<0.000000e+00> : vector<32x256xf32>
    %158 = tpu.matmul %157, %155, %cst_109 {dimension_numbers = #tpu.dot_dimension_numbers<[1], [0], [0], [1], [0, 0, 1, 1], [], []>} : vector<32x32xbf16>, vector<32x256xbf16>, vector<32x256xf32> -> vector<32x256xf32>
    %159 = arith.addf %150, %158 : vector<32x256xf32>
    %c0_110 = arith.constant 0 : index
    %c143_111 = arith.constant 143 : index
    %160 = vector.load %arg6[%c0_110, %c143_111] : memref<32x512xbf16, #tpu.memory_space<vmem>>, vector<32x256xbf16>
    %cst_112 = arith.constant 0.000000e+00 : bf16
    %161 = vector.broadcast %cst_112 : bf16 to vector<32x256xbf16>
    %162 = vector.shape_cast %4 : vector<1x256xi1> to vector<1x256xi1>
    %163 = vector.broadcast %162 : vector<1x256xi1> to vector<32x256xi1>
    %164 = arith.select %163, %160, %161 : vector<32x256xi1>, vector<32x256xbf16>
    %c6_113 = arith.constant 6 : index
    %c96_114 = arith.constant 96 : index
    %c0_115 = arith.constant 0 : index
    %165 = vector.load %arg3[%c6_113, %c96_114, %c0_115] : memref<9x128x32xbf16, #tpu.memory_space<vmem>>, vector<1x32x32xbf16>
    %166 = vector.shape_cast %165 : vector<1x32x32xbf16> to vector<32x32xbf16>
    %cst_116 = arith.constant dense<0.000000e+00> : vector<32x256xf32>
    %167 = tpu.matmul %166, %164, %cst_116 {dimension_numbers = #tpu.dot_dimension_numbers<[1], [0], [0], [1], [0, 0, 1, 1], [], []>} : vector<32x32xbf16>, vector<32x256xbf16>, vector<32x256xf32> -> vector<32x256xf32>
    %168 = arith.addf %159, %167 : vector<32x256xf32>
    %c0_117 = arith.constant 0 : index
    %c144_118 = arith.constant 144 : index
    %169 = vector.load %arg6[%c0_117, %c144_118] : memref<32x512xbf16, #tpu.memory_space<vmem>>, vector<32x256xbf16>
    %c7_119 = arith.constant 7 : index
    %c96_120 = arith.constant 96 : index
    %c0_121 = arith.constant 0 : index
    %170 = vector.load %arg3[%c7_119, %c96_120, %c0_121] : memref<9x128x32xbf16, #tpu.memory_space<vmem>>, vector<1x32x32xbf16>
    %171 = vector.shape_cast %170 : vector<1x32x32xbf16> to vector<32x32xbf16>
    %cst_122 = arith.constant dense<0.000000e+00> : vector<32x256xf32>
    %172 = tpu.matmul %171, %169, %cst_122 {dimension_numbers = #tpu.dot_dimension_numbers<[1], [0], [0], [1], [0, 0, 1, 1], [], []>} : vector<32x32xbf16>, vector<32x256xbf16>, vector<32x256xf32> -> vector<32x256xf32>
    %173 = arith.addf %168, %172 : vector<32x256xf32>
    %c0_123 = arith.constant 0 : index
    %c145_124 = arith.constant 145 : index
    %174 = vector.load %arg6[%c0_123, %c145_124] : memref<32x512xbf16, #tpu.memory_space<vmem>>, vector<32x256xbf16>
    %cst_125 = arith.constant 0.000000e+00 : bf16
    %175 = vector.broadcast %cst_125 : bf16 to vector<32x256xbf16>
    %176 = vector.shape_cast %6 : vector<1x256xi1> to vector<1x256xi1>
    %177 = vector.broadcast %176 : vector<1x256xi1> to vector<32x256xi1>
    %178 = arith.select %177, %174, %175 : vector<32x256xi1>, vector<32x256xbf16>
    %c8_126 = arith.constant 8 : index
    %c96_127 = arith.constant 96 : index
    %c0_128 = arith.constant 0 : index
    %179 = vector.load %arg3[%c8_126, %c96_127, %c0_128] : memref<9x128x32xbf16, #tpu.memory_space<vmem>>, vector<1x32x32xbf16>
    %180 = vector.shape_cast %179 : vector<1x32x32xbf16> to vector<32x32xbf16>
    %cst_129 = arith.constant dense<0.000000e+00> : vector<32x256xf32>
    %181 = tpu.matmul %180, %178, %cst_129 {dimension_numbers = #tpu.dot_dimension_numbers<[1], [0], [0], [1], [0, 0, 1, 1], [], []>} : vector<32x32xbf16>, vector<32x256xbf16>, vector<32x256xf32> -> vector<32x256xf32>
    %182 = arith.addf %173, %181 : vector<32x256xf32>
    %183 = vector.broadcast %112 : vector<32x1xf32> to vector<32x256xf32>
    %184 = arith.addf %182, %183 : vector<32x256xf32>
    %cst_130 = arith.constant 0.000000e+00 : f32
    %185 = vector.broadcast %cst_130 : f32 to vector<32x256xf32>
    %186 = arith.maximumf %184, %185 : vector<32x256xf32>
    %187 = arith.truncf %186 : vector<32x256xf32> to vector<32x256xbf16>
    %c0_131 = arith.constant 0 : index
    %c0_132 = arith.constant 0 : index
    %c0_133 = arith.constant 0 : index
    %188 = vector.load %arg5[%c0_131, %c0_132, %c0_133] : memref<1x192x256xbf16, #tpu.memory_space<vmem>>, vector<1x32x256xbf16>
    %189 = vector.shape_cast %188 : vector<1x32x256xbf16> to vector<32x256xbf16>
    %190 = vector.shape_cast %187 : vector<32x256xbf16> to vector<1x32x256xbf16>
    tpu.vector_store %arg5[%c0_131, %c0_132, %c0_133], %190 {strides = array<i32>} : memref<1x192x256xbf16, #tpu.memory_space<vmem>>, vector<1x32x256xbf16>,
    return
  }
  func.func @transform_0(%arg0: i32) -> (i32, i32, i32) {
    %c0_i32 = arith.constant 0 : i32
    %c0_i32_0 = arith.constant 0 : i32
    %c0_i32_1 = arith.constant 0 : i32
    return %arg0, %c0_i32, %c0_i32_0 : i32, i32, i32
  }
  func.func @transform_1(%arg0: i32) -> (i32, i32) {
    %c0_i32 = arith.constant 0 : i32
    %c0_i32_0 = arith.constant 0 : i32
    %c0_i32_1 = arith.constant 0 : i32
    return %c0_i32, %c0_i32_0 : i32, i32
  }
  func.func @transform_2(%arg0: i32) -> (i32, i32, i32) {
    %c0_i32 = arith.constant 0 : i32
    %c0_i32_0 = arith.constant 0 : i32
    %c0_i32_1 = arith.constant 0 : i32
    %c0_i32_2 = arith.constant 0 : i32
    return %c0_i32, %c0_i32_0, %c0_i32_1 : i32, i32, i32
  }
  func.func @transform_3(%arg0: i32) -> (i32, i32) {
    %c0_i32 = arith.constant 0 : i32
    %c0_i32_0 = arith.constant 0 : i32
    %c0_i32_1 = arith.constant 0 : i32
    return %c0_i32, %c0_i32_0 : i32, i32
  }
  func.func @transform_4(%arg0: i32) -> (i32, i32, i32) {
    %c0_i32 = arith.constant 0 : i32
    %c0_i32_0 = arith.constant 0 : i32
    %c0_i32_1 = arith.constant 0 : i32
    return %arg0, %c0_i32, %c0_i32_0 : i32, i32, i32
  }
}

</mosaic_0001>

<bundles_post_ra>
// kernel: inception3b_forward.1
= control target key start
LH: loop header
LB: loop body
LE: loop exit
PB: predicated region body
PF: predicated region fallthrough
CT: control target
= control target key end

     0   :  { %s4680_s15 = smov 0   ;;  %s5904_s0 = inlined_call_operand.vmem [shape: f32[2,192,256], index: 0, kind: input, shape index: {}]   ;;  %s5905_s1 = inlined_call_operand.vmem [shape: bf16[128,192], index: 1, kind: input, shape index: {}]   ;;  %s5906_s2 = inlined_call_operand.vmem [shape: bf16[9,128,32], index: 2, kind: input, shape index: {}]   ;;  %s5907_s3 = inlined_call_operand.vmem [shape: f32[256,1], index: 3, kind: input, shape index: {}]   ;;  %s5908_s4 = inlined_call_operand.vmem [shape: bf16[2,192,256], index: 4, kind: output, shape index: {}]  }
   0x1 LB: > { %s3902_s16 = sadd.s32 4294967295, %s4644_s15   ;;  %p3906_p0 = scmp.ge.s32.totalorder %s4644_s15, 1  ;;  %s4644_s15 = sphi %s4680_s15, %s14_s15  }
   0x2   : > { %p162_p1 = scmp.lt.s32.totalorder %s4644_s15, 3 }
   0x4   : > { %p163_p2 = pnand %p3906_p0, %p162_p1 }
   0x6   : > { %166 = sbr.rel (%p163_p2) target bundleno = 1429 (0x595), region = 36 }
   0xd   : > { %p188_p3 = scmp.lt.s32.totalorder %s3902_s16, 1  ;;  %vm466_vm0 = vcmask 523264   ;;  %v4544_v0 = vld [vmem:[%s5905_s1 + $0x4] ss:$8 sps:$4 sm:$0xff]   ;;  %v5914_v1 = vmov 0   ;;  %v300_v2 = vld [vmem:[%s5907_s3 + $0x10] sm:$0xff]  ;;  %v201_v5 = vlaneseq }
   0xe   : > { %4531 = vset.pattern.permute.xlu1 %v5914_v1  ;;  %4530 = vset.pattern.permute.xlu0 %v5914_v1  ;;  %v298_v3 = vld [vmem:[%s5907_s3] sm:$0xff]  ;;  %v301_v4 = vld [vmem:[%s5907_s3 + $0x18] sm:$0xff]  ;;  %v299_v6 = vld [vmem:[%s5907_s3 + $0x8] sm:$0xff]  ;;  %s4647_s5 = smov 113   ;;  %s4648_s6 = smov 127   ;;  %vm5910_vm7 = vcmask 924672  }
   0xf   : > { %s5944_s16 = smov (!%p188_p3, %s3902_s16), 1  ;;  %3925 = vmatprep.mubr.msk.bf16.mxu0 %vm466_vm0, %v4544_v0  ;;  %326 = vperm.xlu1 %4531, %v300_v2   ;;  %v202_v14 = vand.u32 127, %v201_v5  ;;  %v757_v36 = vshrl.u32 %v201_v5, 7  ;;  %s4649_s13 = smov 15   ;;  %vm5909_vm10 = vcmask 1039360   ;;  %vm5912_vm13 = vcmask 121856  }
  0x10   : > { %s4511_s25 = smul.u32 384, %s5944_s16  ;;  %316 = vperm.xlu0 %4530, %v298_v3   ;;  %1290 = vmatprep.mubr.bf16.mxu1 %v5914_v1  ;;  %s4650_s14 = smov 1   ;;  %vm861_vm14 = vcmask 261120   ;;  %vm5911_vm15 = vcmask 7168  }
  0x11   : > { %v203_v25 = vadd.s32 128, %v202_v14  ;;  %v204_v32 = vand.u32 15, %v202_v14  ;;  %v762_v45 = vsub.s32 4, %v757_v36  ;;  %v758_v46 = vsub.s32 0, %v757_v36  ;;  %s4651_s27 = smov 111   ;;  %s4653_s7 = smov 16  }
  0x12   : > { %s4713_s30 = scalar_lea.vmem %s5904_s0, %s4511_s25  ;;  %s4654_s10 = smov 112  }
  0x13   : > { %v211_v7 = vld [vmem:[%s4713_s30 + $0x8] sm:$0xff]  ;;  %v213_v8 = vld [vmem:[%s4713_s30 + $0x18] sm:$0xff]  ;;  %v210_v9 = vld [vmem:[%s4713_s30] sm:$0xff]  ;;  %331 = vperm.xlu1 %4531, %v301_v4   ;;  %v205_v33 = vand.u32 15, %v203_v25  ;;  %vm4735_vm1 = vcmp.ne.s32.totalorder %v204_v32, 15  ;;  %vm4745_vm3 = vcmp.ne.s32.totalorder %v204_v32, 0 }
  0x14   : > { %v259_v10 = vpack.c.bf16 %v213_v8, %v211_v7  ;;  %v212_v11 = vld [vmem:[%s4713_s30 + $0x10] sm:$0xff]  ;;  %v215_v12 = vld [vmem:[%s4713_s30 + $0x28] sm:$0xff]  ;;  %v217_v13 = vld [vmem:[%s4713_s30 + $0x38] sm:$0xff]  ;;  %321 = vperm.xlu0 %4530, %v299_v6  }
  0x15   : > { %v258_v15 = vpack.c.bf16 %v212_v11, %v210_v9  ;;  %v261_v16 = vpack.c.bf16 %v217_v13, %v215_v12  ;;  %v214_v17 = vld [vmem:[%s4713_s30 + $0x20] sm:$0xff]  ;;  %v216_v18 = vld [vmem:[%s4713_s30 + $0x30] sm:$0xff]  ;;  %v219_v19 = vld [vmem:[%s4713_s30 + $0x48] sm:$0xff]  ;;  %vm4739_vm2 = vcmp.ne.s32.totalorder %v205_v33, 15  ;;  %vm207_vm4 = vcmp.ne.s32.totalorder %v205_v33, 0 }
  0x16   : > { %491 = vmatprep.subr.bf16.mxu0 %v259_v10  ;;  %v221_v20 = vld [vmem:[%s4713_s30 + $0x58] sm:$0xff]  ;;  %v260_v21 = vpack.c.bf16 %v216_v18, %v214_v17  ;;  %v218_v23 = vld [vmem:[%s4713_s30 + $0x40] sm:$0xff]  ;;  %v220_v24 = vld [vmem:[%s4713_s30 + $0x50] sm:$0xff] }
  0x17   : > { %492 = vmatpush1.bf16.msra.mxu0 %v258_v15  ;;  %v263_v22 = vpack.c.bf16 %v221_v20, %v219_v19  ;;  %v223_v26 = vld [vmem:[%s4713_s30 + $0x68] sm:$0xff]  ;;  %v225_v27 = vld [vmem:[%s4713_s30 + $0x78] sm:$0xff]  ;;  %v262_v28 = vpack.c.bf16 %v220_v24, %v218_v23  ;;  %v222_v30 = vld [vmem:[%s4713_s30 + $0x60] sm:$0xff] }
  0x18   : > { %493 = vmatprep.subr.bf16.mxu0 %v261_v16  ;;  %v265_v29 = vpack.c.bf16 %v225_v27, %v223_v26  ;;  %v224_v31 = vld [vmem:[%s4713_s30 + $0x70] sm:$0xff]  ;;  %v227_v34 = vld [vmem:[%s4713_s30 + $0x88] sm:$0xff]  ;;  %v229_v35 = vld [vmem:[%s4713_s30 + $0x98] sm:$0xff] }
  0x19   : > { %v264_v37 = vpack.c.bf16 %v224_v31, %v222_v30  ;;  %v267_v38 = vpack.c.bf16 %v229_v35, %v227_v34  ;;  %v226_v39 = vld [vmem:[%s4713_s30 + $0x80] sm:$0xff]  ;;  %v228_v40 = vld [vmem:[%s4713_s30 + $0x90] sm:$0xff]  ;;  %v231_v43 = vld [vmem:[%s4713_s30 + $0xa8] sm:$0xff] }
  0x1a   : > { %v233_v44 = vld [vmem:[%s4713_s30 + $0xb8] sm:$0xff]  ;;  %v230_v48 = vld [vmem:[%s4713_s30 + $0xa0] sm:$0xff]  ;;  %v232_v49 = vld [vmem:[%s4713_s30 + $0xb0] sm:$0xff]  ;;  %v266_v50 = vpack.c.bf16 %v228_v40, %v226_v39 }
  0x1b   : > { %494 = vmatpush1.bf16.msra.mxu0 %v260_v21  ;;  %v235_v51 = vld [vmem:[%s4713_s30 + $0xc8] sm:$0xff]  ;;  %v237_v52 = vld [vmem:[%s4713_s30 + $0xd8] sm:$0xff]  ;;  %vm1145_vm5 = vmpackc.low %vm4739_vm2, %vm4735_vm1  ;;  %v269_v53 = vpack.c.bf16 %v233_v44, %v231_v43  ;;  %v268_v60 = vpack.c.bf16 %v232_v49, %v230_v48 }
  0x1c   : > { %495 = vmatprep.subr.bf16.mxu0 %v263_v22  ;;  %v1146_v54 = vsel %vm1145_vm5, 65537, %v5914_v1  ;;  %vm754_vm6 = vmpackc.low %vm207_vm4, %vm4745_vm3  ;;  %v234_v58 = vld [vmem:[%s4713_s30 + $0xc0] sm:$0xff]  ;;  %v236_v59 = vld [vmem:[%s4713_s30 + $0xd0] sm:$0xff]  ;;  %v271_v0 = vpack.c.bf16 %v237_v52, %v235_v51  ;;  %vm768_vm5 = vcmask 908288  }
  0x1d   : > { %v4760_v55 = vrot.slane %v1146_v54, %v762_v45  ;;  %v4762_v56 = vrot.slane %v1146_v54, %v758_v46  ;;  %v755_v57 = vsel %vm754_vm6, 65537, %v5914_v1  ;;  %v239_v61 = vld [vmem:[%s4713_s30 + $0xe8] sm:$0xff]  ;;  %v241_v62 = vld [vmem:[%s4713_s30 + $0xf8] sm:$0xff]  ;;  %v238_v3 = vld [vmem:[%s4713_s30 + $0xe0] sm:$0xff]  ;;  %v270_v5 = vpack.c.bf16 %v236_v59, %v234_v58 }
  0x1e   : > { %v4771_v63 = vrot.slane %v755_v57, %v762_v45  ;;  %v4775_v2 = vrot.slane %v755_v57, %v758_v46  ;;  %v240_v4 = vld [vmem:[%s4713_s30 + $0xf0] sm:$0xff]  ;;  %v243_v6 = vld [vmem:[%s4713_s30 + $0x108] sm:$0xff]  ;;  %v245_v7 = vld [vmem:[%s4713_s30 + $0x118] sm:$0xff]  ;;  %v273_v8 = vpack.c.bf16 %v241_v62, %v239_v61 }
  0x1f   : > { %496 = vmatpush1.bf16.msra.mxu0 %v262_v28  ;;  %1157 = vrot.lane.b32.xlu1 %v4760_v55, %s4647_s5  ;;  %v242_v9 = vld [vmem:[%s4713_s30 + $0x100] sm:$0xff]  ;;  %v244_v10 = vld [vmem:[%s4713_s30 + $0x110] sm:$0xff]  ;;  %v272_v11 = vpack.c.bf16 %v240_v4, %v238_v3  ;;  %v247_v12 = vld [vmem:[%s4713_s30 + $0x128] sm:$0xff]  ;;  %v275_v14 = vpack.c.bf16 %v245_v7, %v243_v6 }
  0x20   : > { %497 = vmatprep.subr.bf16.mxu0 %v265_v29  ;;  %1155 = vrot.lane.b32.xlu0 %v4762_v56, %s4647_s5  ;;  %v249_v13 = vld [vmem:[%s4713_s30 + $0x138] sm:$0xff]  ;;  %v246_v15 = vld [vmem:[%s4713_s30 + $0x120] sm:$0xff]  ;;  %v248_v16 = vld [vmem:[%s4713_s30 + $0x130] sm:$0xff]  ;;  %v274_v17 = vpack.c.bf16 %v244_v10, %v242_v9 }
  0x21   : > { %v251_v18 = vld [vmem:[%s4713_s30 + $0x148] sm:$0xff]  ;;  %v253_v19 = vld [vmem:[%s4713_s30 + $0x158] sm:$0xff]  ;;  %v277_v20 = vpack.c.bf16 %v249_v13, %v247_v12  ;;  %v250_v21 = vld [vmem:[%s4713_s30 + $0x140] sm:$0xff]  ;;  %v276_v23 = vpack.c.bf16 %v248_v16, %v246_v15 }
  0x22   : > { %v252_v22 = vld [vmem:[%s4713_s30 + $0x150] sm:$0xff]  ;;  %v255_v24 = vld [vmem:[%s4713_s30 + $0x168] sm:$0xff]  ;;  %v257_v25 = vld [vmem:[%s4713_s30 + $0x178] sm:$0xff]  ;;  %v279_v26 = vpack.c.bf16 %v253_v19, %v251_v18 }
  0x23   : > { %498 = vmatpush1.bf16.msra.mxu0 %v264_v37  ;;  %1377 = vrot.lane.b32.xlu1 %v4771_v63, %s4648_s6  ;;  %v254_v27 = vld [vmem:[%s4713_s30 + $0x160] sm:$0xff]  ;;  %v256_v28 = vld [vmem:[%s4713_s30 + $0x170] sm:$0xff]  ;;  %v278_v29 = vpack.c.bf16 %v252_v22, %v250_v21  ;;  %v281_v30 = vpack.c.bf16 %v257_v25, %v255_v24  ;;  %s4652_s30 = smov 17  }
  0x24   : > { %499 = vmatprep.subr.bf16.mxu0 %v267_v38  ;;  %1375 = vrot.lane.b32.xlu0 %v4775_v2, %s4648_s6  ;;  %v280_v31 = vpack.c.bf16 %v256_v28, %v254_v27  ;;  %v4542_v32 = vld [vmem:[%s5905_s1] ss:$8 sps:$4 sm:$0xff]   ;;  %v4545_v33 = vld [vmem:[%s5905_s1 + $0x14] ss:$8 sps:$4 sm:$0xff]   ;;  %v4547_v34 = vld [vmem:[%s5905_s1 + $0x10] ss:$8 sps:$4 sm:$0xff]  }
  0x27   : > { %500 = vmatpush1.bf16.msra.mxu0 %v266_v50 }
  0x28   : > { %501 = vmatprep.subr.bf16.mxu0 %v269_v53  ;;  %1219 = vrot.lane.b32.xlu0 %v5914_v1, %s4649_s13 }
  0x2b   : > { %502 = vmatpush1.bf16.msra.mxu0 %v268_v60 }
  0x2c   : > { %503 = vmatprep.subr.bf16.mxu0 %v271_v0 }
  0x2f   : > { %504 = vmatpush1.bf16.msra.mxu0 %v270_v5 }
  0x30   : > { %505 = vmatprep.subr.bf16.mxu0 %v273_v8 }
  0x33   : > { %506 = vmatpush1.bf16.msra.mxu0 %v272_v11 }
  0x34   : > { %507 = vmatprep.subr.bf16.mxu0 %v275_v14 }
  0x37   : > { %508 = vmatpush1.bf16.msra.mxu0 %v274_v17 }
  0x38   : > { %509 = vmatprep.subr.bf16.mxu0 %v277_v20 }
  0x3b   : > { %510 = vmatpush1.bf16.msra.mxu0 %v276_v23 }
  0x3c   : > { %511 = vmatprep.subr.bf16.mxu0 %v279_v26 }
  0x3f   : > { %512 = vmatpush1.bf16.msra.mxu0 %v278_v29 }
  0x40   : > { %513 = vmatprep.subr.bf16.mxu0 %v281_v30 }
  0x43   : > { %514 = vmatpush1.bf16.msra.mxu0 %v280_v31 }
  0x46   : > { %524 = vmatmul.mubr.bf16.vlgmr.msra.gmra.mrb[0].mxu0 %v4542_v32 }
  0x47   : > { %3926 = vmatprep.mubr.msk.bf16.mxu0 %vm466_vm0, %v4545_v33  ;;  %v4548_v33 = vld [vmem:[%s5906_s2 + $0x80] sm:$0xff]  }
  0x4e   : > { %534 = vmatmul.mubr.bf16.gmra.mrb[4].mxu0 %v4547_v34 }
  0x8e   : > { %v327_v35 = vpop.permute.xlu1 %326 }
  0x8f   : > { %v317_v36 = vpop.permute.xlu0 %316 }
  0x92   : > { %v332_v37 = vpop.permute.xlu1 %331 }
  0x93   : > { %v322_v38 = vpop.permute.xlu0 %321 }
  0x96   : > { %v4811_v42 = vpop.permute.xlu1 %1157 }
  0x97   : > { %v1156_v44 = vpop.permute.xlu0 %1155  ;;  %vm1163_vm9 = vcmp.ne.s16.totalorder %v4811_v42, 0 }
  0x98   : > { %v4815_v46 = vsel %vm5910_vm7, %v1156_v44, %v4811_v42 }
  0x99   : > { %vm1162_vm8 = vcmp.ne.s16.totalorder %v4815_v46, 0 }
  0x9a   : > { %v4831_v7 = vpop.permute.xlu1 %1377 }
  0x9b   : > { %v1376_v8 = vpop.permute.xlu0 %1375  ;;  %vm1383_vm12 = vcmp.ne.s16.totalorder %v4831_v7, 0 }
  0x9c   : > { %v4837_v14 = vsel %vm5909_vm10, %v1376_v8, %v4831_v7  ;;  %v4575_v8 = vld [vmem:[%s5905_s1 + $0x20] ss:$8 sps:$4 sm:$0xff]  }
  0x9d   : > { %vm1382_vm11 = vcmp.ne.s16.totalorder %v4837_v14, 0 }
  0x9f   : > { %v1220_v22 = vpop.permute.xlu0 %1219 }
 0x119   : > { %v525_v39 = vpop.f32.mrb[0].mxu0 }
 0x11a   : > { %v526_v40 = vadd.f32 %v525_v39, %v317_v36  ;;  %v527_v41 = vpop.f32.mrb[1].mxu0 }
 0x11b   : > { %v528_v43 = vadd.f32 %v527_v41, %v317_v36  ;;  %v529_v45 = vpop.f32.mrb[2].mxu0 }
 0x11c   : > { %v530_v47 = vadd.f32 %v529_v45, %v322_v38  ;;  %v531_v48 = vpop.f32.mrb[3].mxu0  ;;  %v604_v50 = vmax.f32 %v526_v40, 0.0  ;;  %v4549_v40 = vld [vmem:[%s5906_s2 + $0x88] sm:$0xff]  }
 0x11d   : > { %v532_v49 = vadd.f32 %v531_v48, %v322_v38  ;;  %v605_v52 = vmax.f32 %v528_v43, 0.0 }
 0x11e   : > { %v606_v51 = vmax.f32 %v530_v47, 0.0 }
 0x11f   : > { %v607_v53 = vmax.f32 %v532_v49, 0.0  ;;  %v4550_v49 = vld [vmem:[%s5906_s2 + $0x90] sm:$0xff]  }
 0x120   : > { %v4819_v54 = vpack.c.bf16 %v606_v51, %v604_v50 }
 0x121   : > { %v4821_v57 = vpack.c.bf16 %v607_v53, %v605_v52  ;;  %v535_v58 = vpop.f32.mrb[4].mxu0 }
 0x122   : > { %v536_v59 = vadd.f32 %v535_v58, %v327_v35  ;;  %v537_v60 = vpop.f32.mrb[5].mxu0  ;;  %v1165_v61 = vsel %vm1162_vm8, %v4819_v54, 0  ;;  %v1385_v18 = vsel %vm1382_vm11, %v4819_v54, 0 }
 0x123   : > { %v538_v62 = vadd.f32 %v537_v60, %v327_v35  ;;  %v539_v0 = vpop.f32.mrb[6].mxu0  ;;  %1221 = vrot.lane.b32.xlu0 %v1165_v61, %s4649_s13  ;;  %v1166_v3 = vsel %vm1163_vm9, %v4821_v57, 0  ;;  %v1386_v19 = vsel %vm1383_vm12, %v4821_v57, 0  ;;  %v4551_v61 = vld [vmem:[%s5906_s2 + $0x98] sm:$0xff]  }
 0x124   : > { %v540_v4 = vadd.f32 %v539_v0, %v332_v37  ;;  %v541_v5 = vpop.f32.mrb[7].mxu0  ;;  %1223 = vrot.lane.b32.xlu1 %v1166_v3, %s4649_s13  ;;  %v608_v9 = vmax.f32 %v536_v59, 0.0  ;;  %v4552_v3 = vld [vmem:[%s5906_s2 + $0xa0] sm:$0xff]  }
 0x125   : > { %v542_v6 = vadd.f32 %v541_v5, %v332_v37  ;;  %v609_v11 = vmax.f32 %v538_v62, 0.0 }
 0x126   : > { %v610_v10 = vmax.f32 %v540_v4, 0.0 }
 0x127   : > { %v611_v12 = vmax.f32 %v542_v6, 0.0  ;;  %v4553_v6 = vld [vmem:[%s5906_s2 + $0xa8] sm:$0xff]  }
 0x128   : > { %v4833_v13 = vpack.c.bf16 %v610_v10, %v608_v9  ;;  %v4557_v9 = vld [vmem:[%s5906_s2 + $0xd8] sm:$0xff]  }
 0x129   : > { %v4839_v15 = vpack.c.bf16 %v611_v12, %v609_v11  ;;  %v4576_v10 = vld [vmem:[%s5905_s1 + $0x34] ss:$8 sps:$4 sm:$0xff]   ;;  %v4578_v11 = vld [vmem:[%s5905_s1 + $0x30] ss:$8 sps:$4 sm:$0xff]   ;;  %v4579_v12 = vld [vmem:[%s5905_s1 + $0x44] ss:$8 sps:$4 sm:$0xff]  }
 0x12a   : > { %v1168_v16 = vsel %vm1162_vm8, %v4833_v13, 0  ;;  %v1388_v20 = vsel %vm1382_vm11, %v4833_v13, 0 }
 0x12b   : > { %1227 = vrot.lane.b32.xlu1 %v1168_v16, %s4649_s13  ;;  %v1169_v17 = vsel %vm1163_vm9, %v4839_v15, 0  ;;  %v1389_v21 = vsel %vm1383_vm12, %v4839_v15, 0  ;;  %v4558_v16 = vld [vmem:[%s5906_s2 + $0xe0] sm:$0xff]  }
 0x12c   : > { %1229 = vrot.lane.b32.xlu0 %v1169_v17, %s4649_s13  ;;  %v4582_v17 = vld [vmem:[%s5905_s1 + $0x40] ss:$8 sps:$4 sm:$0xff]  }
 0x12f   : > { %1225 = vrot.lane.b32.xlu1 %v5914_v1, %s4649_s13 }
 0x130   : > { %1441 = vrot.lane.b32.xlu0 %v1385_v18, %s4650_s14  ;;  %v4583_v18 = vld [vmem:[%s5905_s1 + $0x54] ss:$8 sps:$4 sm:$0xff]  }
 0x133   : > { %1443 = vrot.lane.b32.xlu1 %v1386_v19, %s4650_s14  ;;  %v4559_v19 = vld [vmem:[%s5906_s2 + $0xe8] sm:$0xff]  }
 0x134   : > { %1439 = vrot.lane.b32.xlu0 %v5914_v1, %s4650_s14 }
 0x137   : > { %1447 = vrot.lane.b32.xlu1 %v1388_v20, %s4650_s14  ;;  %v4586_v20 = vld [vmem:[%s5905_s1 + $0x50] ss:$8 sps:$4 sm:$0xff]  }
 0x138   : > { %1449 = vrot.lane.b32.xlu0 %v1389_v21, %s4650_s14  ;;  %v4587_v21 = vld [vmem:[%s5905_s1 + $0x64] ss:$8 sps:$4 sm:$0xff]  }
 0x13b   : > { %1445 = vrot.lane.b32.xlu1 %v5914_v1, %s4650_s14 }
 0x13c   : > { %1779 = vrot.lane.b32.xlu0 %v4762_v56, %s4650_s14 }
 0x13f   : > { %1781 = vrot.lane.b32.xlu1 %v4760_v55, %s4650_s14 }
 0x140   : > { %1997 = vrot.lane.b32.xlu0 %v4775_v2, %s4649_s13 }
 0x143   : > { %1999 = vrot.lane.b32.xlu1 %v4771_v63, %s4649_s13 }
 0x147   : > { %1846 = vrot.lane.b32.xlu1 %v5914_v1, %s4648_s6 }
 0x195   : > { %v1222_v23 = vpop.permute.xlu0 %1221 }
 0x196   : > { %v1224_v24 = vpop.permute.xlu1 %1223  ;;  %v1232_v26 = vsel %vm5912_vm13, %v1220_v22, %v1222_v23  ;;  %v4560_v22 = vld [vmem:[%s5906_s2 + $0x100] sm:$0xff]  }
 0x197   : > { %v1233_v25 = vsel %vm5912_vm13, %v1222_v23, %v1224_v24  ;;  %v4590_v23 = vld [vmem:[%s5905_s1 + $0x60] ss:$8 sps:$4 sm:$0xff]   ;;  %v4591_v24 = vld [vmem:[%s5905_s1 + $0x74] ss:$8 sps:$4 sm:$0xff]  }
 0x198   : > { %1258 = vmatprep.subr.bf16.mxu1 %v1233_v25  ;;  %v4561_v25 = vld [vmem:[%s5906_s2 + $0x108] sm:$0xff]  }
 0x199   : > { %1259 = vmatpush1.bf16.msra.mxu1 %v1232_v26  ;;  %v4594_v26 = vld [vmem:[%s5905_s1 + $0x70] ss:$8 sps:$4 sm:$0xff]  }
 0x19d   : > { %v1228_v27 = vpop.permute.xlu1 %1227 }
 0x19e   : > { %v1230_v28 = vpop.permute.xlu0 %1229 }
 0x19f   : > { %v1235_v29 = vsel %vm5912_vm13, %v1228_v27, %v1230_v28  ;;  %v4563_v28 = vld [vmem:[%s5906_s2 + $0x118] sm:$0xff]  }
 0x1a0   : > { %1260 = vmatprep.subr.bf16.mxu1 %v1235_v29 }
 0x1a1   : > { %v1226_v30 = vpop.permute.xlu1 %1225 }
 0x1a2   : > { %v1442_v31 = vpop.permute.xlu0 %1441  ;;  %v1234_v32 = vsel %vm5912_vm13, %v1226_v30, %v1228_v27  ;;  %v4562_v27 = vld [vmem:[%s5906_s2 + $0x110] sm:$0xff]   ;;  %v4564_v30 = vld [vmem:[%s5906_s2 + $0x120] sm:$0xff]  }
 0x1a3   : > { %1261 = vmatpush1.bf16.msra.mxu1 %v1234_v32 }
 0x1a5   : > { %v1444_v34 = vpop.permute.xlu1 %1443 }
 0x1a6   : > { %3999 = vmatmul.mubr.msk.bf16.vlgmr.msra.gmra.mrb[0].mxu1 %vm861_vm14, %v4548_v33  ;;  %v1440_v35 = vpop.permute.xlu0 %1439  ;;  %v1453_v36 = vsel %vm5911_vm15, %v1442_v31, %v1444_v34  ;;  %v4565_v34 = vld [vmem:[%s5906_s2 + $0x128] sm:$0xff]  }
 0x1a7   : > { %v1452_v37 = vsel %vm5911_vm15, %v1440_v35, %v1442_v31  ;;  %1478 = vmatprep.subr.bf16.mxu1 %v1453_v36  ;;  %1300 = vmatprep.mubr.bf16.mxu1 %v5914_v1 }
 0x1a8   : > { %1479 = vmatpush1.bf16.msra.mxu1 %v1452_v37 }
 0x1a9   : > { %v1448_v38 = vpop.permute.xlu1 %1447 }
 0x1aa   : > { %v1450_v39 = vpop.permute.xlu0 %1449 }
 0x1ab   : > { %v1455_v41 = vsel %vm5911_vm15, %v1448_v38, %v1450_v39 }
 0x1ac   : > { %1480 = vmatprep.subr.bf16.mxu1 %v1455_v41 }
 0x1ad   : > { %v1446_v43 = vpop.permute.xlu1 %1445 }
 0x1ae   : > { %v1454_v44 = vsel %vm5911_vm15, %v1446_v43, %v1448_v38  ;;  %4000 = vmatmul.mubr.msk.bf16.gmra.mrb[4].mxu1 %vm861_vm14, %v4549_v40  ;;  %v4902_v45 = vpop.permute.xlu0 %1779  ;;  %v4566_v43 = vld [vmem:[%s5906_s2 + $0x140] sm:$0xff]  }
 0x1af   : > { %1481 = vmatpush1.bf16.msra.mxu1 %v1454_v44  ;;  %1310 = vmatprep.mubr.bf16.mxu1 %v5914_v1  ;;  %vm1784_vm2 = vcmp.ne.s16.totalorder %v4902_v45, 0 }
 0x1b0   : > { %1656 = vmatprep.subr.bf16.mxu1 %v4821_v57  ;;  %v1790_v53 = vsel %vm1784_vm2, %v4833_v13, 0  ;;  %v1787_v58 = vsel %vm1784_vm2, %v4819_v54, 0 }
 0x1b1   : > { %v1782_v47 = vpop.permute.xlu1 %1781 }
 0x1b2   : > { %v4906_v48 = vsel %vm5911_vm15, %v4902_v45, %v1782_v47  ;;  %v4929_v59 = vpop.permute.xlu0 %1997 }
 0x1b3   : > { %vm1785_vm1 = vcmp.ne.s16.totalorder %v4906_v48, 0  ;;  %vm5913_vm4 = vcmp.ne.s16.totalorder %v4929_v59, 0 }
 0x1b4   : > { %v1791_v50 = vsel %vm1785_vm1, %v4839_v15, 0  ;;  %v1788_v51 = vsel %vm1785_vm1, %v4821_v57, 0  ;;  %v2008_v4 = vsel %vm5913_vm4, %v4833_v13, 0  ;;  %v2005_v5 = vsel %vm5913_vm4, %v4819_v54, 0 }
 0x1b5   : > { %1850 = vrot.lane.b32.xlu1 %v1791_v50, %s4648_s6  ;;  %1844 = vrot.lane.b32.xlu0 %v1788_v51, %s4648_s6  ;;  %v2000_v52 = vpop.permute.xlu1 %1999  ;;  %vm2276_vm4 = vcmask 916480  }
 0x1b6   : > { %4001 = vmatmul.mubr.msk.bf16.gmra.mrb[8].mxu1 %vm861_vm14, %v4550_v49  ;;  %v4935_v60 = vsel %vm5912_vm13, %v4929_v59, %v2000_v52  ;;  %vm852_vm13 = vcmask 130048  }
 0x1b7   : > { %1320 = vmatprep.mubr.bf16.mxu1 %v5914_v1  ;;  %vm2003_vm3 = vcmp.ne.s16.totalorder %v4935_v60, 0 }
 0x1b8   : > { %v2009_v62 = vsel %vm2003_vm3, %v4839_v15, 0  ;;  %v2006_v0 = vsel %vm2003_vm3, %v4821_v57, 0 }
 0x1b9   : > { %1848 = vrot.lane.b32.xlu1 %v1790_v53, %s4648_s6  ;;  %1842 = vrot.lane.b32.xlu0 %v1787_v58, %s4648_s6  ;;  %v1847_v29 = vpop.permute.xlu1 %1846  ;;  %v4567_v53 = vld [vmem:[%s5906_s2 + $0x148] sm:$0xff]  }
 0x1bd   : > { %2064 = vrot.lane.b32.xlu1 %v5914_v1, %s4647_s5  ;;  %1852 = vrot.lane.b32.xlu0 %v5914_v1, %s4648_s6 }
 0x1be   : > { %4002 = vmatmul.mubr.msk.bf16.gmra.mrb[12].mxu1 %vm861_vm14, %v4551_v61 }
 0x1bf   : > { %1330 = vmatprep.mubr.bf16.mxu1 %v5914_v1 }
 0x1c1   : > { %2068 = vrot.lane.b32.xlu1 %v2009_v62, %s4647_s5  ;;  %2062 = vrot.lane.b32.xlu0 %v2006_v0, %s4647_s5 }
 0x1c5   : > { %2066 = vrot.lane.b32.xlu1 %v2008_v4, %s4647_s5  ;;  %2060 = vrot.lane.b32.xlu0 %v2005_v5, %s4647_s5 }
 0x1c6   : > { %4003 = vmatmul.mubr.msk.bf16.gmra.mrb[16].mxu1 %vm861_vm14, %v4552_v3 }
 0x1c7   : > { %1340 = vmatprep.mubr.bf16.mxu1 %v5914_v1 }
 0x1c9   : > { %766 = vrot.lane.b32.xlu1 %v4771_v63, %s4651_s27  ;;  %2070 = vrot.lane.b32.xlu0 %v5914_v1, %s4647_s5  ;;  %v4554_v63 = vld [vmem:[%s5906_s2 + $0xc0] sm:$0xff]  }
 0x1cd   : > { %2422 = vrot.lane.b32.xlu1 %v4760_v55, %s4652_s30  ;;  %764 = vrot.lane.b32.xlu0 %v4775_v2, %s4651_s27  ;;  %v4555_v55 = vld [vmem:[%s5906_s2 + $0xc8] sm:$0xff]   ;;  %v4556_v2 = vld [vmem:[%s5906_s2 + $0xd0] sm:$0xff]  }
 0x1ce   : > { %4004 = vmatmul.mubr.msk.bf16.gmra.mrb[20].mxu1 %vm861_vm14, %v4553_v6 }
 0x1cf   : > { %1510 = vmatprep.mubr.bf16.mxu1 %v5914_v1 }
 0x1d1   : > { %844 = vrot.lane.b32.xlu1 %v4821_v57, %s4653_s7  ;;  %2420 = vrot.lane.b32.xlu0 %v4762_v56, %s4652_s30  ;;  %v4572_v56 = vld [vmem:[%s5905_s1 + $0x24] ss:$8 sps:$4 sm:$0xff]  }
 0x1d2   : > { %3927 = vmatprep.mubr.msk.bf16.mxu0 %vm466_vm0, %v4572_v56 }
 0x1d3   : > { %544 = vmatmul.mubr.bf16.gmra.mrb[8].mxu0 %v4575_v8 }
 0x1d4   : > { %3928 = vmatprep.mubr.msk.bf16.mxu0 %vm466_vm0, %v4576_v10 }
 0x1d5   : > { %4533 = vrot.lane.b32.xlu1 %v5914_v1, %s4654_s10  ;;  %842 = vrot.lane.b32.xlu0 %v4819_v54, %s4653_s7 }
 0x1d6   : > { %4023 = vmatmul.mubr.msk.bf16.vlgmr.msra.gmra.mrb[0].mxu1 %vm861_vm14, %v4554_v63 }
 0x1d7   : > { %1657 = vmatpush1.bf16.msra.mxu1 %v4819_v54  ;;  %1520 = vmatprep.mubr.bf16.mxu1 %v5914_v1 }
 0x1d8   : > { %1658 = vmatprep.subr.bf16.mxu1 %v4839_v15 }
 0x1d9   : > { %2264 = vrot.lane.b32.xlu1 %v4819_v54, %s4654_s10  ;;  %2266 = vrot.lane.b32.xlu0 %v4821_v57, %s4654_s10 }
 0x1db   : > { %1659 = vmatpush1.bf16.msra.mxu1 %v4833_v13  ;;  %554 = vmatmul.mubr.bf16.gmra.mrb[12].mxu0 %v4578_v11 }
 0x1dc   : > { %3929 = vmatprep.mubr.msk.bf16.mxu0 %vm466_vm0, %v4579_v12 }
 0x1dd   : > { %850 = vrot.lane.b32.xlu1 %v4839_v15, %s4653_s7  ;;  %840 = vrot.lane.b32.xlu0 %v5914_v1, %s4653_s7 }
 0x1de   : > { %4024 = vmatmul.mubr.msk.bf16.gmra.mrb[4].mxu1 %vm861_vm14, %v4555_v55  ;;  %v4568_v55 = vld [vmem:[%s5906_s2 + $0x150] sm:$0xff]  }
 0x1df   : > { %1530 = vmatprep.mubr.bf16.mxu1 %v5914_v1 }
 0x1e1   : > { %846 = vrot.lane.b32.xlu1 %v5914_v1, %s4653_s7  ;;  %848 = vrot.lane.b32.xlu0 %v4833_v13, %s4653_s7 }
 0x1e3   : > { %564 = vmatmul.mubr.bf16.gmra.mrb[16].mxu0 %v4582_v17 }
 0x1e4   : > { %3930 = vmatprep.mubr.msk.bf16.mxu0 %vm466_vm0, %v4583_v18 }
 0x1e5   : > { %2272 = vrot.lane.b32.xlu0 %v4839_v15, %s4654_s10 }
 0x1e6   : > { %4025 = vmatmul.mubr.msk.bf16.gmra.mrb[8].mxu1 %vm861_vm14, %v4556_v2 }
 0x1e7   : > { %1540 = vmatprep.mubr.bf16.mxu1 %v5914_v1 }
 0x1e9   : > { %2270 = vrot.lane.b32.xlu0 %v4833_v13, %s4654_s10 }
 0x1eb   : > { %574 = vmatmul.mubr.bf16.gmra.mrb[20].mxu0 %v4586_v20 }
 0x1ec   : > { %3931 = vmatprep.mubr.msk.bf16.mxu0 %vm466_vm0, %v4587_v21 }
 0x1ee   : > { %4026 = vmatmul.mubr.msk.bf16.gmra.mrb[12].mxu1 %vm861_vm14, %v4557_v9 }
 0x1ef   : > { %1550 = vmatprep.mubr.bf16.mxu1 %v5914_v1 }
 0x1f3   : > { %584 = vmatmul.mubr.bf16.gmra.mrb[24].mxu0 %v4590_v23 }
 0x1f4   : > { %3932 = vmatprep.mubr.msk.bf16.mxu0 %vm466_vm0, %v4591_v24  ;;  %v732_v24 = vld [vmem:[%s5907_s3 + $0x80] sm:$0xff] }
 0x1f6   : > { %4027 = vmatmul.mubr.msk.bf16.gmra.mrb[16].mxu1 %vm861_vm14, %v4558_v16 }
 0x1f7   : > { %1560 = vmatprep.mubr.bf16.mxu1 %v5914_v1 }
 0x1fb   : > { %594 = vmatmul.mubr.bf16.gmra.mrb[28].mxu0 %v4594_v26 }
 0x1fc   : > { %912 = vmatprep.mubr.bf16.mxu0 %v5914_v1 }
 0x1fe   : > { %4028 = vmatmul.mubr.msk.bf16.gmra.mrb[20].mxu1 %vm861_vm14, %v4559_v19 }
 0x1ff   : > { %1688 = vmatprep.mubr.bf16.mxu1 %v5914_v1 }
 0x206   : > { %4047 = vmatmul.mubr.msk.bf16.vlgmr.msra.gmra.mrb[0].mxu1 %vm861_vm14, %v4560_v22 }
 0x207   : > { %1698 = vmatprep.mubr.bf16.mxu1 %v5914_v1 }
 0x20e   : > { %4048 = vmatmul.mubr.msk.bf16.gmra.mrb[4].mxu1 %vm861_vm14, %v4561_v25 }
 0x20f   : > { %1708 = vmatprep.mubr.bf16.mxu1 %v5914_v1 }
 0x216   : > { %4049 = vmatmul.mubr.msk.bf16.gmra.mrb[8].mxu1 %vm861_vm14, %v4562_v27  ;;  %v4570_v27 = vld [vmem:[%s5906_s2 + $0x160] sm:$0xff]  }
 0x217   : > { %1718 = vmatprep.mubr.bf16.mxu1 %v5914_v1 }
 0x21e   : > { %4050 = vmatmul.mubr.msk.bf16.gmra.mrb[12].mxu1 %vm861_vm14, %v4563_v28 }
 0x21f   : > { %1728 = vmatprep.mubr.bf16.mxu1 %v5914_v1 }
 0x226   : > { %4051 = vmatmul.mubr.msk.bf16.gmra.mrb[16].mxu1 %vm861_vm14, %v4564_v30  ;;  %v734_v30 = vld [vmem:[%s5907_s3 + $0x90] sm:$0xff] }
 0x227   : > { %v1851_v31 = vpop.permute.xlu1 %1850  ;;  %v1845_v32 = vpop.permute.xlu0 %1844  ;;  %1738 = vmatprep.mubr.bf16.mxu1 %v5914_v1 }
 0x228   : > { %v1855_v33 = vsel %vm5909_vm10, %v1845_v32, %v1847_v29 }
 0x229   : > { %1880 = vmatprep.subr.bf16.mxu1 %v1855_v33  ;;  %v4596_v33 = vld [vmem:[%s5906_s2 + $0x40] sm:$0xff]  }
 0x22b   : > { %v1849_v35 = vpop.permute.xlu1 %1848  ;;  %v1843_v36 = vpop.permute.xlu0 %1842 }
 0x22c   : > { %v1854_v37 = vsel %vm5909_vm10, %v1843_v36, %v1845_v32  ;;  %v1856_v41 = vsel %vm5909_vm10, %v1849_v35, %v1851_v31  ;;  %v4571_v35 = vld [vmem:[%s5906_s2 + $0x168] sm:$0xff]  }
 0x22d   : > { %1881 = vmatpush1.bf16.msra.mxu1 %v1854_v37  ;;  %v4598_v36 = vld [vmem:[%s5906_s2 + $0x48] sm:$0xff]  }
 0x22e   : > { %4052 = vmatmul.mubr.msk.bf16.gmra.mrb[20].mxu1 %vm861_vm14, %v4565_v34  ;;  %v733_v34 = vld [vmem:[%s5907_s3 + $0x88] sm:$0xff] }
 0x22f   : > { %v2065_v38 = vpop.permute.xlu1 %2064  ;;  %v1853_v39 = vpop.permute.xlu0 %1852  ;;  %1912 = vmatprep.mubr.bf16.mxu1 %v5914_v1 }
 0x230   : > { %v1857_v40 = vsel %vm5909_vm10, %v1851_v31, %v1853_v39  ;;  %vm1021_vm10 = vcmask 138240  }
 0x231   : > { %1882 = vmatprep.subr.bf16.mxu1 %v1857_v40 }
 0x232   : > { %1883 = vmatpush1.bf16.msra.mxu1 %v1856_v41  ;;  %v4600_v41 = vld [vmem:[%s5906_s2 + $0x50] sm:$0xff]  }
 0x233   : > { %v2069_v44 = vpop.permute.xlu1 %2068  ;;  %v2063_v47 = vpop.permute.xlu0 %2062 }
 0x234   : > { %v2073_v49 = vsel %vm5910_vm7, %v2063_v47, %v2065_v38  ;;  %v4574_v38 = vld [vmem:[%s5906_s2 + $0x180] sm:$0xff]  }
 0x235   : > { %2098 = vmatprep.subr.bf16.mxu1 %v2073_v49  ;;  %v4581_v49 = vld [vmem:[%s5906_s2 + $0x188] sm:$0xff]  }
 0x236   : > { %4071 = vmatmul.mubr.msk.bf16.vlgmr.msra.gmra.mrb[0].mxu1 %vm861_vm14, %v4566_v43 }
 0x237   : > { %v2067_v50 = vpop.permute.xlu1 %2066  ;;  %v2061_v51 = vpop.permute.xlu0 %2060  ;;  %1922 = vmatprep.mubr.bf16.mxu1 %v5914_v1 }
 0x238   : > { %v2072_v52 = vsel %vm5910_vm7, %v2061_v51, %v2063_v47  ;;  %v2074_v3 = vsel %vm5910_vm7, %v2067_v50, %v2069_v44  ;;  %v4602_v50 = vld [vmem:[%s5906_s2 + $0x58] sm:$0xff]   ;;  %v4585_v51 = vld [vmem:[%s5906_s2 + $0x190] sm:$0xff]  }
 0x239   : > { %2099 = vmatpush1.bf16.msra.mxu1 %v2072_v52  ;;  %v4604_v52 = vld [vmem:[%s5906_s2 + $0x60] sm:$0xff]  }
 0x23b   : > { %v5126_v58 = vpop.permute.xlu1 %766  ;;  %v2071_v61 = vpop.permute.xlu0 %2070 }
 0x23c   : > { %vm772_vm0 = vcmp.ne.s16.totalorder %v5126_v58, 0  ;;  %v2075_v62 = vsel %vm5910_vm7, %v2069_v44, %v2071_v61  ;;  %v4606_v61 = vld [vmem:[%s5906_s2 + $0x68] sm:$0xff]  }
 0x23d   : > { %2100 = vmatprep.subr.bf16.mxu1 %v2075_v62  ;;  %v775_v0 = vsel %vm772_vm0, %v4821_v57, 0  ;;  %v778_v17 = vsel %vm772_vm0, %v4839_v15, 0  ;;  %v4593_v62 = vld [vmem:[%s5906_s2 + $0x1a0] sm:$0xff]  }
 0x23e   : > { %1013 = vrot.lane.b32.xlu0 %v775_v0, %s4652_s30  ;;  %4072 = vmatmul.mubr.msk.bf16.gmra.mrb[4].mxu1 %vm861_vm14, %v4567_v53  ;;  %v4589_v53 = vld [vmem:[%s5906_s2 + $0x198] sm:$0xff]   ;;  %v4595_v0 = vld [vmem:[%s5906_s2 + $0x1a8] sm:$0xff]  }
 0x23f   : > { %2101 = vmatpush1.bf16.msra.mxu1 %v2074_v3  ;;  %v2423_v4 = vpop.permute.xlu1 %2422  ;;  %v765_v5 = vpop.permute.xlu0 %764  ;;  %1932 = vmatprep.mubr.bf16.mxu1 %v5914_v1  ;;  %v4597_v3 = vld [vmem:[%s5906_s2 + $0x1c0] sm:$0xff]  }
 0x240   : > { %v5139_v6 = vsel %vm768_vm5, %v765_v5, %v5126_v58  ;;  %v4601_v5 = vld [vmem:[%s5906_s2 + $0x1d0] sm:$0xff]  }
 0x241   : > { %vm771_vm6 = vcmp.ne.s16.totalorder %v5139_v6, 0 }
 0x242   : > { %4538 = vrot.lane.b32.xlu0 %v5914_v1, %s4651_s27  ;;  %v774_v63 = vsel %vm771_vm6, %v4819_v54, 0  ;;  %v777_v21 = vsel %vm771_vm6, %v4833_v13, 0 }
 0x243   : > { %v845_v56 = vpop.permute.xlu1 %844  ;;  %1011 = vrot.lane.b32.xlu1 %v774_v63, %s4652_s30  ;;  %v5151_v2 = vpop.permute.xlu0 %2420  ;;  %v4603_v63 = vld [vmem:[%s5906_s2 + $0x1d8] sm:$0xff]  }
 0x244   : > { %v5155_v8 = vsel %vm1021_vm10, %v5151_v2, %v2423_v4  ;;  %vm2425_vm7 = vcmp.ne.s16.totalorder %v5151_v2, 0  ;;  %v4599_v4 = vld [vmem:[%s5906_s2 + $0x1c8] sm:$0xff]   ;;  %v306_v2 = vld [vmem:[%s5907_s3 + $0x40] sm:$0xff] }
 0x245   : > { %vm2426_vm15 = vcmp.ne.s16.totalorder %v5155_v8, 0  ;;  %v2428_v9 = vsel %vm2425_vm7, %v4819_v54, 0  ;;  %v303_v8 = vld [vmem:[%s5907_s3 + $0x28] sm:$0xff] }
 0x246   : > { %4073 = vmatmul.mubr.msk.bf16.gmra.mrb[8].mxu1 %vm861_vm14, %v4568_v55  ;;  %2483 = vrot.lane.b32.xlu0 %v2428_v9, %s4651_s27  ;;  %v2429_v10 = vsel %vm2426_vm15, %v4821_v57, 0  ;;  %v4569_v57 = vld [vmem:[%s5906_s2 + $0x158] sm:$0xff]   ;;  %v2432_v26 = vsel %vm2426_vm15, %v4839_v15, 0  ;;  %v2431_v15 = vsel %vm2425_vm7, %v4833_v13, 0 }
 0x247   : > { %v5167_v11 = vpop.permute.xlu1 %4533  ;;  %2485 = vrot.lane.b32.xlu1 %v2429_v10, %s4651_s27  ;;  %v843_v12 = vpop.permute.xlu0 %842  ;;  %1942 = vmatprep.mubr.bf16.mxu1 %v5914_v1  ;;  %v735_v13 = vld [vmem:[%s5907_s3 + $0x98] sm:$0xff] }
 0x248   : > { %v4535_v16 = vunpack.i.l.bf16 %v5167_v11  ;;  %v854_v54 = vsel %vm852_vm13, %v843_v12, %v845_v56  ;;  %v4536_v39 = vunpack.i.h.bf16 %v5167_v11  ;;  %v4605_v56 = vld [vmem:[%s5906_s2 + $0x1e0] sm:$0xff]  }
 0x249   : > { %880 = vmatprep.subr.bf16.mxu0 %v854_v54 }
 0x24a   : > { %1019 = vrot.lane.b32.xlu0 %v778_v17, %s4652_s30 }
 0x24b   : > { %v2265_v18 = vpop.permute.xlu1 %2264  ;;  %1009 = vrot.lane.b32.xlu1 %v5914_v1, %s4652_s30  ;;  %v2267_v19 = vpop.permute.xlu0 %2266 }
 0x24c   : > { %v2278_v20 = vsel %vm2276_vm4, %v2267_v19, %v4535_v16  ;;  %v2277_v40 = vsel %vm2276_vm4, %v2265_v18, %v2267_v19  ;;  %v4607_v18 = vld [vmem:[%s5906_s2 + $0x1e8] sm:$0xff]  }
 0x24d   : > { %2303 = vmatprep.subr.bf16.mxu1 %v2278_v20 }
 0x24e   : > { %4074 = vmatmul.mubr.msk.bf16.gmra.mrb[12].mxu1 %vm861_vm14, %v4569_v57  ;;  %1015 = vrot.lane.b32.xlu0 %v5914_v1, %s4652_s30 }
 0x24f   : > { %v851_v22 = vpop.permute.xlu1 %850  ;;  %1017 = vrot.lane.b32.xlu1 %v777_v21, %s4652_s30  ;;  %v841_v23 = vpop.permute.xlu0 %840  ;;  %1952 = vmatprep.mubr.bf16.mxu1 %v5914_v1 }
 0x250   : > { %v853_v25 = vsel %vm852_vm13, %v841_v23, %v843_v12 }
 0x251   : > { %881 = vmatpush1.bf16.msra.mxu0 %v853_v25 }
 0x252   : > { %2640 = vperm.xlu0 %4530, %v732_v24  }
 0x253   : > { %v847_v28 = vpop.permute.xlu1 %846  ;;  %2491 = vrot.lane.b32.xlu1 %v2432_v26, %s4651_s27  ;;  %v849_v29 = vpop.permute.xlu0 %848 }
 0x254   : > { %v855_v31 = vsel %vm852_vm13, %v847_v28, %v849_v29  ;;  %v856_v32 = vsel %vm852_vm13, %v849_v29, %v851_v22 }
 0x255   : > { %882 = vmatprep.subr.bf16.mxu0 %v856_v32 }
 0x256   : > { %4075 = vmatmul.mubr.msk.bf16.gmra.mrb[16].mxu1 %vm861_vm14, %v4570_v27  ;;  %2650 = vperm.xlu0 %4530, %v734_v30   ;;  %v4608_v30 = vld [vmem:[%s5906_s2] sm:$0xff]  }
 0x257   : > { %883 = vmatpush1.bf16.msra.mxu0 %v855_v31  ;;  %2489 = vrot.lane.b32.xlu1 %v2431_v15, %s4651_s27  ;;  %v2273_v37 = vpop.permute.xlu0 %2272 }
 0x258   : > { %1962 = vmatprep.mubr.bf16.mxu1 %v5914_v1  ;;  %v2280_v44 = vsel %vm2276_vm4, %v2273_v37, %v4536_v39  ;;  %v4610_v39 = vld [vmem:[%s5906_s2 + $0x8] sm:$0xff]  }
 0x25a   : > { %3963 = vmatmul.mubr.msk.bf16.vlgmr.msra.gmra.mrb[32].mxu0 %vm861_vm14, %v4596_v33  ;;  %2850 = vrot.lane.b32.xlu0 %v5914_v1, %s4653_s7 }
 0x25b   : > { %2645 = vperm.xlu1 %4531, %v733_v34   ;;  %922 = vmatprep.mubr.bf16.mxu0 %v5914_v1  ;;  %v2271_v43 = vpop.permute.xlu0 %2270 }
 0x25c   : > { %v2279_v47 = vsel %vm2276_vm4, %v2271_v43, %v2273_v37 }
 0x25e   : > { %4076 = vmatmul.mubr.msk.bf16.gmra.mrb[20].mxu1 %vm861_vm14, %v4571_v35 }
 0x25f   : > { %2655 = vperm.xlu1 %4531, %v735_v13   ;;  %2130 = vmatprep.mubr.bf16.mxu1 %v5914_v1 }
 0x262   : > { %3964 = vmatmul.mubr.msk.bf16.gmra.mrb[36].mxu0 %vm861_vm14, %v4598_v36 }
 0x263   : > { %932 = vmatprep.mubr.bf16.mxu0 %v5914_v1 }
 0x266   : > { %4095 = vmatmul.mubr.msk.bf16.vlgmr.msra.gmra.mrb[0].mxu1 %vm861_vm14, %v4574_v38  ;;  %v4609_v38 = vld [vmem:[%s5906_s2 + $0x200] sm:$0xff]  }
 0x267   : > { %2304 = vmatpush1.bf16.msra.mxu1 %v2277_v40  ;;  %2140 = vmatprep.mubr.bf16.mxu1 %v5914_v1 }
 0x268   : > { %2305 = vmatprep.subr.bf16.mxu1 %v2280_v44 }
 0x26a   : > { %3965 = vmatmul.mubr.msk.bf16.gmra.mrb[40].mxu0 %vm861_vm14, %v4600_v41 }
 0x26b   : > { %2306 = vmatpush1.bf16.msra.mxu1 %v2279_v47  ;;  %942 = vmatprep.mubr.bf16.mxu0 %v5914_v1  ;;  %v4611_v47 = vld [vmem:[%s5906_s2 + $0x208] sm:$0xff]  }
 0x26e   : > { %4096 = vmatmul.mubr.msk.bf16.gmra.mrb[4].mxu1 %vm861_vm14, %v4581_v49  ;;  %v4612_v49 = vld [vmem:[%s5906_s2 + $0x10] sm:$0xff]  }
 0x26f   : > { %2150 = vmatprep.mubr.bf16.mxu1 %v5914_v1 }
 0x272   : > { %3966 = vmatmul.mubr.msk.bf16.gmra.mrb[44].mxu0 %vm861_vm14, %v4602_v50 }
 0x273   : > { %952 = vmatprep.mubr.bf16.mxu0 %v5914_v1 }
 0x276   : > { %4097 = vmatmul.mubr.msk.bf16.gmra.mrb[8].mxu1 %vm861_vm14, %v4585_v51 }
 0x277   : > { %2160 = vmatprep.mubr.bf16.mxu1 %v5914_v1 }
 0x27a   : > { %3967 = vmatmul.mubr.msk.bf16.gmra.mrb[48].mxu0 %vm861_vm14, %v4604_v52 }
 0x27b   : > { %962 = vmatprep.mubr.bf16.mxu0 %v5914_v1 }
 0x27e   : > { %4098 = vmatmul.mubr.msk.bf16.gmra.mrb[12].mxu1 %vm861_vm14, %v4589_v53 }
 0x27f   : > { %2170 = vmatprep.mubr.bf16.mxu1 %v5914_v1 }
 0x282   : > { %3968 = vmatmul.mubr.msk.bf16.gmra.mrb[52].mxu0 %vm861_vm14, %v4606_v61  ;;  %v4613_v61 = vld [vmem:[%s5906_s2 + $0x210] sm:$0xff]  }
 0x283   : > { %1080 = vmatprep.mubr.bf16.mxu0 %v5914_v1 }
 0x286   : > { %4099 = vmatmul.mubr.msk.bf16.gmra.mrb[16].mxu1 %vm861_vm14, %v4593_v62  ;;  %v4614_v62 = vld [vmem:[%s5906_s2 + $0x18] sm:$0xff]  }
 0x287   : > { %2180 = vmatprep.mubr.bf16.mxu1 %v5914_v1 }
 0x28e   : > { %4100 = vmatmul.mubr.msk.bf16.gmra.mrb[20].mxu1 %vm861_vm14, %v4595_v0 }
 0x28f   : > { %2335 = vmatprep.mubr.bf16.mxu1 %v5914_v1 }
 0x296   : > { %4119 = vmatmul.mubr.msk.bf16.vlgmr.msra.gmra.mrb[0].mxu1 %vm861_vm14, %v4597_v3 }
 0x297   : > { %2345 = vmatprep.mubr.bf16.mxu1 %v5914_v1 }
 0x29e   : > { %4120 = vmatmul.mubr.msk.bf16.gmra.mrb[4].mxu1 %vm861_vm14, %v4599_v4 }
 0x29f   : > { %2355 = vmatprep.mubr.bf16.mxu1 %v5914_v1 }
 0x2a6   : > { %4121 = vmatmul.mubr.msk.bf16.gmra.mrb[8].mxu1 %vm861_vm14, %v4601_v5  ;;  %v5321_v19 = vpop.f32.mrb[8].mxu0 }
 0x2a7   : > { %2365 = vmatprep.mubr.bf16.mxu1 %v5914_v1  ;;  %v5323_v21 = vpop.f32.mrb[9].mxu0 }
 0x2a8   : > { %v5325_v23 = vpop.f32.mrb[10].mxu0 }
 0x2a9   : > { %v5329_v25 = vpop.f32.mrb[11].mxu0 }
 0x2ae   : > { %4122 = vmatmul.mubr.msk.bf16.gmra.mrb[12].mxu1 %vm861_vm14, %v4603_v63  ;;  %v5337_v31 = vpop.f32.mrb[12].mxu0  ;;  %v4615_v63 = vld [vmem:[%s5906_s2 + $0x218] sm:$0xff]  }
 0x2af   : > { %2375 = vmatprep.mubr.bf16.mxu1 %v5914_v1  ;;  %v5339_v15 = vpop.f32.mrb[13].mxu0 }
 0x2b0   : > { %v1014_v55 = vpop.permute.xlu0 %1013  ;;  %v5341_v34 = vpop.f32.mrb[14].mxu0 }
 0x2b1   : > { %v5344_v13 = vpop.f32.mrb[15].mxu0 }
 0x2b4   : > { %v4539_v9 = vpop.permute.xlu0 %4538 }
 0x2b5   : > { %v1012_v10 = vpop.permute.xlu1 %1011  ;;  %v4540_v11 = vunpack.i.l.bf16 %v4539_v9  ;;  %v4541_v32 = vunpack.i.h.bf16 %v4539_v9 }
 0x2b6   : > { %v1023_v12 = vsel %vm1021_vm10, %v1012_v10, %v1014_v55  ;;  %4123 = vmatmul.mubr.msk.bf16.gmra.mrb[16].mxu1 %vm861_vm14, %v4605_v56  ;;  %v5355_v40 = vpop.f32.mrb[16].mxu0  ;;  %v4616_v55 = vld [vmem:[%s5906_s2 + $0x20] sm:$0xff]  }
 0x2b7   : > { %1048 = vmatprep.subr.bf16.mxu0 %v1023_v12  ;;  %2385 = vmatprep.mubr.bf16.mxu1 %v5914_v1  ;;  %v5357_v41 = vpop.f32.mrb[17].mxu0  ;;  %v4617_v12 = vld [vmem:[%s5906_s2 + $0x220] sm:$0xff]  }
 0x2b8   : > { %v2484_v16 = vpop.permute.xlu0 %2483  ;;  %v5359_v43 = vpop.f32.mrb[18].mxu0 }
 0x2b9   : > { %v2486_v54 = vpop.permute.xlu1 %2485  ;;  %v5362_v44 = vpop.f32.mrb[19].mxu0 }
 0x2ba   : > { %v2495_v17 = vsel %vm768_vm5, %v2484_v16, %v2486_v54  ;;  %v2496_v57 = vsel %vm768_vm5, %v2486_v54, %v4540_v11  ;;  %v4618_v16 = vld [vmem:[%s5906_s2 + $0x28] sm:$0xff]  }
 0x2bb   : > { %2521 = vmatprep.subr.bf16.mxu1 %v2496_v57  ;;  %v4619_v54 = vld [vmem:[%s5906_s2 + $0x228] sm:$0xff]  }
 0x2bc   : > { %v1020_v20 = vpop.permute.xlu0 %1019  ;;  %2522 = vmatpush1.bf16.msra.mxu1 %v2495_v17 }
 0x2bd   : > { %v1010_v22 = vpop.permute.xlu1 %1009 }
 0x2be   : > { %v1022_v24 = vsel %vm1021_vm10, %v1010_v22, %v1012_v10  ;;  %4124 = vmatmul.mubr.msk.bf16.gmra.mrb[20].mxu1 %vm861_vm14, %v4607_v18  ;;  %v5373_v50 = vpop.f32.mrb[20].mxu0 }
 0x2bf   : > { %1049 = vmatpush1.bf16.msra.mxu0 %v1022_v24  ;;  %2553 = vmatprep.mubr.bf16.mxu1 %v5914_v1  ;;  %v5375_v51 = vpop.f32.mrb[21].mxu0 }
 0x2c0   : > { %v1016_v26 = vpop.permute.xlu0 %1015  ;;  %v5377_v52 = vpop.f32.mrb[22].mxu0 }
 0x2c1   : > { %v1018_v27 = vpop.permute.xlu1 %1017  ;;  %v5380_v53 = vpop.f32.mrb[23].mxu0 }
 0x2c2   : > { %v1024_v28 = vsel %vm1021_vm10, %v1016_v26, %v1018_v27  ;;  %v1025_v29 = vsel %vm1021_vm10, %v1018_v27, %v1020_v20 }
 0x2c3   : > { %1050 = vmatprep.subr.bf16.mxu0 %v1025_v29 }
 0x2c4   : > { %1051 = vmatpush1.bf16.msra.mxu0 %v1024_v28 }
 0x2c5   : > { %v2492_v33 = vpop.permute.xlu1 %2491 }
 0x2c6   : > { %v2498_v35 = vsel %vm768_vm5, %v2492_v33, %v4541_v32  ;;  %v5391_v0 = vpop.f32.mrb[24].mxu0 }
 0x2c7   : > { %3975 = vmatmul.mubr.msk.bf16.vlgmr.msra.gmra.mrb[32].mxu0 %vm861_vm14, %v4608_v30  ;;  %2523 = vmatprep.subr.bf16.mxu1 %v2498_v35  ;;  %v5393_v3 = vpop.f32.mrb[25].mxu0 }
 0x2c8   : > { %1090 = vmatprep.mubr.bf16.mxu0 %v5914_v1  ;;  %v5395_v4 = vpop.f32.mrb[26].mxu0 }
 0x2c9   : > { %v2490_v36 = vpop.permute.xlu1 %2489  ;;  %v5398_v5 = vpop.f32.mrb[27].mxu0 }
 0x2ca   : > { %v2497_v37 = vsel %vm768_vm5, %v2490_v36, %v2492_v33 }
 0x2cb   : > { %2524 = vmatpush1.bf16.msra.mxu1 %v2497_v37 }
 0x2ce   : > { %4143 = vmatmul.mubr.msk.bf16.vlgmr.msra.gmra.mrb[0].mxu1 %vm861_vm14, %v4609_v38  ;;  %v5409_v56 = vpop.f32.mrb[28].mxu0 }
 0x2cf   : > { %3976 = vmatmul.mubr.msk.bf16.gmra.mrb[36].mxu0 %vm861_vm14, %v4610_v39  ;;  %2563 = vmatprep.mubr.bf16.mxu1 %v5914_v1  ;;  %v5411_v9 = vpop.f32.mrb[29].mxu0 }
 0x2d0   : > { %1100 = vmatprep.mubr.bf16.mxu0 %v5914_v1  ;;  %v5413_v10 = vpop.f32.mrb[30].mxu0 }
 0x2d1   : > { %v5416_v11 = vpop.f32.mrb[31].mxu0  ;;  %v2641_v22 = vpop.permute.xlu0 %2640 }
 0x2d6   : > { %4144 = vmatmul.mubr.msk.bf16.gmra.mrb[4].mxu1 %vm861_vm14, %v4611_v47 }
 0x2d7   : > { %3977 = vmatmul.mubr.msk.bf16.gmra.mrb[40].mxu0 %vm861_vm14, %v4612_v49  ;;  %2573 = vmatprep.mubr.bf16.mxu1 %v5914_v1 }
 0x2d8   : > { %1110 = vmatprep.mubr.bf16.mxu0 %v5914_v1 }
 0x2da   : > { %v2646_v38 = vpop.permute.xlu1 %2645 }
 0x2de   : > { %4145 = vmatmul.mubr.msk.bf16.gmra.mrb[8].mxu1 %vm861_vm14, %v4613_v61 }
 0x2df   : > { %3978 = vmatmul.mubr.msk.bf16.gmra.mrb[44].mxu0 %vm861_vm14, %v4614_v62  ;;  %2583 = vmatprep.mubr.bf16.mxu1 %v5914_v1 }
 0x2e0   : > { %1120 = vmatprep.mubr.bf16.mxu0 %v5914_v1 }
 0x2e6   : > { %4146 = vmatmul.mubr.msk.bf16.gmra.mrb[12].mxu1 %vm861_vm14, %v4615_v63 }
 0x2e7   : > { %3979 = vmatmul.mubr.msk.bf16.gmra.mrb[48].mxu0 %vm861_vm14, %v4616_v55  ;;  %2593 = vmatprep.mubr.bf16.mxu1 %v5914_v1 }
 0x2e8   : > { %1130 = vmatprep.mubr.bf16.mxu0 %v5914_v1 }
 0x2ee   : > { %4147 = vmatmul.mubr.msk.bf16.gmra.mrb[16].mxu1 %vm861_vm14, %v4617_v12  ;;  %v2651_v12 = vpop.permute.xlu0 %2650 }
 0x2ef   : > { %3980 = vmatmul.mubr.msk.bf16.gmra.mrb[52].mxu0 %vm861_vm14, %v4618_v16  ;;  %2603 = vmatprep.mubr.bf16.mxu1 %v5914_v1 }
 0x2f0   : > { %2908 = vmatprep.mubr.bf16.mxu0 %v5914_v1 }
 0x2f6   : > { %4148 = vmatmul.mubr.msk.bf16.gmra.mrb[20].mxu1 %vm861_vm14, %v4619_v54 }
 0x39a   : > { %v1082_v17 = vpop.f32.mrb[32].mxu0 }
 0x39b   : > { %v1084_v57 = vpop.f32.mrb[33].mxu0 }
 0x39c   : > { %v1086_v18 = vpop.f32.mrb[34].mxu0 }
 0x39d   : > { %v1088_v20 = vpop.f32.mrb[35].mxu0 }
 0x3a1   : > { %v2555_v24 = vpop.f32.mrb[0].mxu1 }
 0x3a2   : > { %v4255_v26 = vadd.f32 %v2555_v24, %v1082_v17  ;;  %v1092_v27 = vpop.f32.mrb[36].mxu0  ;;  %v2557_v28 = vpop.f32.mrb[1].mxu1 }
 0x3a3   : > { %v4256_v29 = vadd.f32 %v2557_v28, %v1084_v57  ;;  %v1094_v30 = vpop.f32.mrb[37].mxu0  ;;  %v2559_v32 = vpop.f32.mrb[2].mxu1 }
 0x3a4   : > { %v2698_v33 = vadd.f32 %v4255_v26, %v2641_v22  ;;  %v4257_v35 = vadd.f32 %v2559_v32, %v1086_v18  ;;  %v1096_v36 = vpop.f32.mrb[38].mxu0  ;;  %v2561_v37 = vpop.f32.mrb[3].mxu1 }
 0x3a5   : > { %v2699_v39 = vadd.f32 %v4256_v29, %v2641_v22  ;;  %v4258_v47 = vadd.f32 %v2561_v37, %v1088_v20  ;;  %v1098_v49 = vpop.f32.mrb[39].mxu0  ;;  %v2656_v37 = vpop.permute.xlu1 %2655 }
 0x3a6   : > { %v2700_v61 = vadd.f32 %v4257_v35, %v2646_v38  ;;  %v2722_v63 = vmax.f32 %v2698_v33, 0.0 }
 0x3a7   : > { %v2701_v62 = vadd.f32 %v4258_v47, %v2646_v38  ;;  %v2723_v16 = vmax.f32 %v2699_v39, 0.0 }
 0x3a8   : > { %v2724_v55 = vmax.f32 %v2700_v61, 0.0 }
 0x3a9   : > { %v2725_v54 = vmax.f32 %v2701_v62, 0.0  ;;  %v2565_v17 = vpop.f32.mrb[4].mxu1 }
 0x3aa   : > { %v5435_v24 = vpack.c.bf16 %v2724_v55, %v2722_v63  ;;  %v4259_v57 = vadd.f32 %v2565_v17, %v1092_v27  ;;  %v1102_v28 = vpop.f32.mrb[40].mxu0  ;;  %v2567_v26 = vpop.f32.mrb[5].mxu1 }
 0x3ab   : > { %v5437_v18 = vpack.c.bf16 %v2725_v54, %v2723_v16  ;;  %v4260_v32 = vadd.f32 %v2567_v26, %v1094_v30  ;;  %v1104_v1 = vpop.f32.mrb[41].mxu0  ;;  %v2569_v22 = vpop.f32.mrb[6].mxu1 }
 0x3ac   : > { %v2702_v20 = vadd.f32 %v4259_v57, %v2651_v12  ;;  %v4261_v29 = vadd.f32 %v2569_v22, %v1096_v36  ;;  %v1106_v35 = vpop.f32.mrb[42].mxu0  ;;  %2852 = vrot.lane.b32.xlu0 %v5435_v24, %s4653_s7  ;;  %v2571_v33 = vpop.f32.mrb[7].mxu1  ;;  %v3025_v58 = vsel %vm1162_vm8, %v5435_v24, 0  ;;  %v3138_v46 = vsel %vm1382_vm11, %v5435_v24, 0 }
 0x3ad   : > { %v2703_v38 = vadd.f32 %v4260_v32, %v2651_v12  ;;  %v4262_v39 = vadd.f32 %v2571_v33, %v1098_v49  ;;  %v1108_v47 = vpop.f32.mrb[43].mxu0  ;;  %2854 = vrot.lane.b32.xlu1 %v5437_v18, %s4653_s7  ;;  %v3337_v14 = vsel %vm1784_vm2, %v5435_v24, 0  ;;  %v3670_v60 = vsel %vm2425_vm7, %v5435_v24, 0 }
 0x3ae   : > { %v2704_v27 = vadd.f32 %v4261_v29, %v2656_v37  ;;  %v2726_v62 = vmax.f32 %v2702_v20, 0.0 }
 0x3af   : > { %v2705_v61 = vadd.f32 %v4262_v39, %v2656_v37  ;;  %v2727_v63 = vmax.f32 %v2703_v38, 0.0 }
 0x3b0   : > { %v2728_v30 = vmax.f32 %v2704_v27, 0.0 }
 0x3b1   : > { %v2729_v55 = vmax.f32 %v2705_v61, 0.0  ;;  %v2575_v16 = vpop.f32.mrb[8].mxu1 }
 0x3b2   : > { %v5443_v36 = vpack.c.bf16 %v2728_v30, %v2726_v62  ;;  %v5445_v54 = vadd.f32 %v2575_v16, %v1102_v28  ;;  %v1112_v17 = vpop.f32.mrb[44].mxu0  ;;  %v2577_v57 = vpop.f32.mrb[9].mxu1  ;;  %v5922_v28 = vmov 0   ;;  %v2822_v30 = vsel %vm772_vm0, %v5437_v18, 0 }
 0x3b3   : > { %v5447_v26 = vpack.c.bf16 %v2729_v55, %v2727_v63  ;;  %v5449_v49 = vadd.f32 %v2577_v57, %v1104_v1  ;;  %v1114_v12 = vpop.f32.mrb[45].mxu0  ;;  %v2579_v32 = vpop.f32.mrb[10].mxu1  ;;  %v2821_v1 = vsel %vm771_vm6, %v5435_v24, 0 }
 0x3b4   : > { %v5451_v22 = vadd.f32 %v2579_v32, %v1106_v35  ;;  %v1116_v29 = vpop.f32.mrb[46].mxu0  ;;  %2858 = vrot.lane.b32.xlu1 %v5443_v36, %s4653_s7  ;;  %v2581_v20 = vpop.f32.mrb[11].mxu1  ;;  %v3141_v42 = vsel %vm1382_vm11, %v5443_v36, 0 }
 0x3b5   : > { %v5455_v33 = vadd.f32 %v2581_v20, %v1108_v47  ;;  %v1118_v37 = vpop.f32.mrb[47].mxu0  ;;  %2860 = vrot.lane.b32.xlu0 %v5447_v26, %s4653_s7  ;;  %v2825_v32 = vsel %vm772_vm0, %v5447_v26, 0  ;;  %v3341_v7 = vsel %vm1785_vm1, %v5447_v26, 0  ;;  %v3454_v45 = vsel %vm2003_vm3, %v5447_v26, 0 }
 0x3b8   : > { %2856 = vrot.lane.b32.xlu1 %v5922_v28, %s4653_s7 }
 0x3b9   : > { %2947 = vrot.lane.b32.xlu0 %v2821_v1, %s4652_s30  ;;  %v2585_v35 = vpop.f32.mrb[12].mxu1 }
 0x3ba   : > { %v5465_v38 = vadd.f32 %v2585_v35, %v1112_v17  ;;  %v1122_v39 = vpop.f32.mrb[48].mxu0  ;;  %v2587_v27 = vpop.f32.mrb[13].mxu1 }
 0x3bb   : > { %v5467_v47 = vadd.f32 %v2587_v27, %v1114_v12  ;;  %v1124_v61 = vpop.f32.mrb[49].mxu0  ;;  %v2589_v62 = vpop.f32.mrb[14].mxu1  ;;  %v2824_v12 = vsel %vm771_vm6, %v5443_v36, 0 }
 0x3bc   : > { %v5472_v63 = vadd.f32 %v2589_v62, %v1116_v29  ;;  %v1126_v55 = vpop.f32.mrb[50].mxu0  ;;  %2949 = vrot.lane.b32.xlu1 %v2822_v30, %s4652_s30  ;;  %v2591_v16 = vpop.f32.mrb[15].mxu1 }
 0x3bd   : > { %v5475_v57 = vadd.f32 %v2591_v16, %v1118_v37  ;;  %v1128_v17 = vpop.f32.mrb[51].mxu0  ;;  %2945 = vrot.lane.b32.xlu0 %v5922_v28, %s4652_s30 }
 0x3c0   : > { %2953 = vrot.lane.b32.xlu1 %v2824_v12, %s4652_s30 }
 0x3c1   : > { %2955 = vrot.lane.b32.xlu0 %v2825_v32, %s4652_s30  ;;  %v2595_v29 = vpop.f32.mrb[16].mxu1 }
 0x3c2   : > { %v5487_v20 = vadd.f32 %v2595_v29, %v1122_v39  ;;  %v1132_v37 = vpop.f32.mrb[52].mxu0  ;;  %v2597_v1 = vpop.f32.mrb[17].mxu1 }
 0x3c3   : > { %v5489_v35 = vadd.f32 %v2597_v1, %v1124_v61  ;;  %v1134_v27 = vpop.f32.mrb[53].mxu0  ;;  %v2599_v62 = vpop.f32.mrb[18].mxu1  ;;  %v3026_v61 = vsel %vm1163_vm9, %v5437_v18, 0 }
 0x3c4   : > { %v5491_v30 = vadd.f32 %v2599_v62, %v1126_v55  ;;  %v1136_v6 = vpop.f32.mrb[54].mxu0  ;;  %2951 = vrot.lane.b32.xlu1 %v5922_v28, %s4652_s30  ;;  %v2601_v16 = vpop.f32.mrb[19].mxu1  ;;  %v3028_v62 = vsel %vm1162_vm8, %v5443_v36, 0  ;;  %vm5924_vm8 = vcmp.ne.s16.totalorder %v4929_v59, 0  ;;  %v3671_v59 = vsel %vm2426_vm15, %v5437_v18, 0 }
 0x3c5   : > { %v5498_v12 = vadd.f32 %v2601_v16, %v1128_v17  ;;  %v1138_v39 = vpop.f32.mrb[55].mxu0  ;;  %3052 = vrot.lane.b32.xlu0 %v3025_v58, %s4649_s13  ;;  %v3450_v48 = vsel %vm5924_vm8, %v5435_v24, 0 }
 0x3c7   : > { %5923 = vst [vmem:[#allocation3_spill] sm:$0xff] %v5498_v12 }
 0x3c8   : > { %3054 = vrot.lane.b32.xlu1 %v3026_v61, %s4649_s13  ;;  %v3029_v61 = vsel %vm1163_vm9, %v5447_v26, 0  ;;  %vm5925_vm9 = vmmov %vm5924_vm8 }
 0x3c9   : > { %3050 = vrot.lane.b32.xlu0 %v5922_v28, %s4649_s13  ;;  %v2605_v55 = vpop.f32.mrb[20].mxu1 }
 0x3ca   : > { %v5507_v32 = vadd.f32 %v2605_v55, %v1132_v37  ;;  %v2607_v29 = vpop.f32.mrb[21].mxu1  ;;  %v3139_v37 = vsel %vm1383_vm12, %v5437_v18, 0  ;;  %v3451_v55 = vsel %vm2003_vm3, %v5437_v18, 0  ;;  %vm5934_vm3 = vcmask 1039360  }
 0x3cb   : > { %v5509_v1 = vadd.f32 %v2607_v29, %v1134_v27  ;;  %v2609_v17 = vpop.f32.mrb[22].mxu1  ;;  %v3142_v27 = vsel %vm1383_vm12, %v5447_v26, 0  ;;  %v3453_v29 = vsel %vm5925_vm9, %v5443_v36, 0  ;;  %vm5935_vm0 = vmmov %vm5934_vm3  ;;  %vm5938_vm9 = vcmask 924672  }
 0x3cc   : > { %v5514_v16 = vadd.f32 %v2609_v17, %v1136_v6  ;;  %3058 = vrot.lane.b32.xlu1 %v3028_v62, %s4649_s13  ;;  %v2611_v58 = vpop.f32.mrb[23].mxu1  ;;  %v3338_v6 = vsel %vm1785_vm1, %v5437_v18, 0  ;;  %v3674_v17 = vsel %vm2426_vm15, %v5447_v26, 0  ;;  %v302_v62 = vld [vmem:[%s5907_s3 + $0x20] sm:$0xff]  ;;  %vm5936_vm6 = vmmov %vm5935_vm0 }
 0x3cd   : > { %v5520_v12 = vadd.f32 %v2611_v58, %v1138_v39  ;;  %3060 = vrot.lane.b32.xlu0 %v3029_v61, %s4649_s13  ;;  %v3340_v39 = vsel %vm1784_vm2, %v5443_v36, 0  ;;  %v3673_v58 = vsel %vm2425_vm7, %v5443_v36, 0  ;;  %v304_v61 = vld [vmem:[%s5907_s3 + $0x30] sm:$0xff]  ;;  %vm5926_vm7 = vcmask 121856   ;;  %vm5937_vm8 = vmmov %vm5935_vm0 }
 0x3ce   : > { %vm5928_vm11 = vmmov %vm5926_vm7 }
 0x3cf   : > { %vm5929_vm12 = vmmov %vm5926_vm7 }
 0x3d0   : > { %3056 = vrot.lane.b32.xlu1 %v5922_v28, %s4649_s13  ;;  %s4512_s13 = smul.u32 192, %s5944_s16 }
 0x3d1   : > { %3165 = vrot.lane.b32.xlu0 %v3138_v46, %s4650_s14  ;;  %v305_v46 = vld [vmem:[%s5907_s3 + $0x38] sm:$0xff] }
 0x3d2   : > { %s5799_s7 = scalar_lea.vmem %s5908_s4, %s4512_s13 }
 0x3d4   : > { %3167 = vrot.lane.b32.xlu1 %v3139_v37, %s4650_s14  ;;  %v307_v37 = vld [vmem:[%s5907_s3 + $0x48] sm:$0xff] }
 0x3d5   : > { %3163 = vrot.lane.b32.xlu0 %v5922_v28, %s4650_s14 }
 0x3d8   : > { %3171 = vrot.lane.b32.xlu1 %v3141_v42, %s4650_s14  ;;  %v308_v42 = vld [vmem:[%s5907_s3 + $0x50] sm:$0xff] }
 0x3d9   : > { %3173 = vrot.lane.b32.xlu0 %v3142_v27, %s4650_s14  ;;  %v2851_v27 = vpop.permute.xlu0 %2850 }
 0x3dc   : > { %3169 = vrot.lane.b32.xlu1 %v5922_v28, %s4650_s14 }
 0x3dd   : > { %3365 = vrot.lane.b32.xlu0 %v3338_v6, %s4648_s6  ;;  %v309_v6 = vld [vmem:[%s5907_s3 + $0x58] sm:$0xff] }
 0x3e0   : > { %3367 = vrot.lane.b32.xlu1 %v5922_v28, %s4648_s6 }
 0x3e1   : > { %3363 = vrot.lane.b32.xlu0 %v3337_v14, %s4648_s6  ;;  %v310_v14 = vld [vmem:[%s5907_s3 + $0x60] sm:$0xff] }
 0x3e4   : > { %3371 = vrot.lane.b32.xlu1 %v3341_v7, %s4648_s6  ;;  %v311_v7 = vld [vmem:[%s5907_s3 + $0x68] sm:$0xff] }
 0x3e5   : > { %3373 = vrot.lane.b32.xlu0 %v5922_v28, %s4648_s6 }
 0x3e8   : > { %3369 = vrot.lane.b32.xlu1 %v3340_v39, %s4648_s6 }
 0x3e9   : > { %3478 = vrot.lane.b32.xlu0 %v3451_v55, %s4647_s5  ;;  %v312_v55 = vld [vmem:[%s5907_s3 + $0x70] sm:$0xff] }
 0x3ec   : > { %3480 = vrot.lane.b32.xlu1 %v5922_v28, %s4647_s5 }
 0x3ed   : > { %3476 = vrot.lane.b32.xlu0 %v3450_v48, %s4647_s5 }
 0x3f0   : > { %3484 = vrot.lane.b32.xlu1 %v3454_v45, %s4647_s5 }
 0x3f1   : > { %3486 = vrot.lane.b32.xlu0 %v5922_v28, %s4647_s5 }
 0x3f4   : > { %3482 = vrot.lane.b32.xlu1 %v3453_v29, %s4647_s5 }
 0x3f5   : > { %3585 = vrot.lane.b32.xlu0 %v5437_v18, %s4654_s10 }
 0x3f8   : > { %3587 = vrot.lane.b32.xlu1 %v5922_v28, %s4654_s10 }
 0x3f9   : > { %3583 = vrot.lane.b32.xlu0 %v5435_v24, %s4654_s10 }
 0x3fc   : > { %3591 = vrot.lane.b32.xlu1 %v5447_v26, %s4654_s10 }
 0x3fd   : > { %3593 = vrot.lane.b32.xlu0 %v5922_v28, %s4654_s10 }
 0x400   : > { %3589 = vrot.lane.b32.xlu1 %v5443_v36, %s4654_s10 }
 0x401   : > { %3698 = vrot.lane.b32.xlu0 %v3671_v59, %s4651_s27  ;;  %v313_v59 = vld [vmem:[%s5907_s3 + $0x78] sm:$0xff] }
 0x404   : > { %3700 = vrot.lane.b32.xlu1 %v5922_v28, %s4651_s27 }
 0x405   : > { %3696 = vrot.lane.b32.xlu0 %v3670_v60, %s4651_s27  ;;  %v736_v60 = vld [vmem:[%s5907_s3 + $0xa0] sm:$0xff] }
 0x408   : > { %3704 = vrot.lane.b32.xlu1 %v3674_v17, %s4651_s27  ;;  %v737_v17 = vld [vmem:[%s5907_s3 + $0xa8] sm:$0xff] }
 0x409   : > { %3706 = vrot.lane.b32.xlu0 %v5922_v28, %s4651_s27 }
 0x40c   : > { %3702 = vrot.lane.b32.xlu1 %v3673_v58, %s4651_s27  ;;  %v738_v58 = vld [vmem:[%s5907_s3 + $0xb0] sm:$0xff] }
 0x40d   : > { %336 = vperm.xlu0 %4530, %v302_v62  }
 0x410   : > { %341 = vperm.xlu1 %4531, %v303_v8  }
 0x411   : > { %346 = vperm.xlu0 %4530, %v304_v61  }
 0x414   : > { %351 = vperm.xlu1 %4531, %v305_v46   ;;  %v739_v46 = vld [vmem:[%s5907_s3 + $0xb8] sm:$0xff] }
 0x415   : > { %356 = vperm.xlu0 %4530, %v306_v2  }
 0x418   : > { %361 = vperm.xlu1 %4531, %v307_v37   ;;  %v740_v37 = vld [vmem:[%s5907_s3 + $0xc0] sm:$0xff] }
 0x419   : > { %366 = vperm.xlu0 %4530, %v308_v42  }
 0x41c   : > { %371 = vperm.xlu1 %4531, %v309_v6   ;;  %v4620_v6 = vld [vmem:[%s5906_s2 + $0x70] sm:$0xff]  }
 0x41d   : > { %376 = vperm.xlu0 %4530, %v310_v14   ;;  %v741_v14 = vld [vmem:[%s5907_s3 + $0xc8] sm:$0xff] }
 0x41e   : > { %v2853_v39 = vpop.permute.xlu0 %2852 }
 0x41f   : > { %v2855_v48 = vpop.permute.xlu1 %2854  ;;  %v2862_v29 = vsel %vm852_vm13, %v2851_v27, %v2853_v39 }
 0x420   : > { %381 = vperm.xlu1 %4531, %v311_v7   ;;  %v2863_v45 = vsel %vm852_vm13, %v2853_v39, %v2855_v48  ;;  %v742_v39 = vld [vmem:[%s5907_s3 + $0xd0] sm:$0xff] }
 0x421   : > { %2876 = vmatprep.subr.bf16.mxu0 %v2863_v45  ;;  %386 = vperm.xlu0 %4530, %v312_v55  }
 0x422   : > { %2877 = vmatpush1.bf16.msra.mxu0 %v2862_v29  ;;  %v743_v29 = vld [vmem:[%s5907_s3 + $0xd8] sm:$0xff] }
 0x424   : > { %391 = vperm.xlu1 %4531, %v313_v59  }
 0x425   : > { %2660 = vperm.xlu0 %4530, %v736_v60   ;;  %v2810_v60 = vld [vmem:[%s5907_s3 + $0xe0] sm:$0xff] }
 0x426   : > { %v2859_v62 = vpop.permute.xlu1 %2858 }
 0x427   : > { %v2861_v8 = vpop.permute.xlu0 %2860 }
 0x428   : > { %2665 = vperm.xlu1 %4531, %v737_v17   ;;  %v2865_v61 = vsel %vm852_vm13, %v2859_v62, %v2861_v8  ;;  %v2811_v8 = vld [vmem:[%s5907_s3 + $0xe8] sm:$0xff] }
 0x429   : > { %2878 = vmatprep.subr.bf16.mxu0 %v2865_v61  ;;  %2670 = vperm.xlu0 %4530, %v738_v58  }
 0x42a   : > { %v2857_v2 = vpop.permute.xlu1 %2856 }
 0x42b   : > { %v2864_v42 = vsel %vm852_vm13, %v2857_v2, %v2859_v62  ;;  %v2948_v27 = vpop.permute.xlu0 %2947  ;;  %v4621_v62 = vld [vmem:[%s5906_s2 + $0x78] sm:$0xff]   ;;  %vm5930_vm13 = vcmask 7168  }
 0x42c   : > { %2879 = vmatpush1.bf16.msra.mxu0 %v2864_v42  ;;  %2675 = vperm.xlu1 %4531, %v739_v46   ;;  %v2812_v46 = vld [vmem:[%s5907_s3 + $0xf0] sm:$0xff]  ;;  %v2813_v42 = vld [vmem:[%s5907_s3 + $0xf8] sm:$0xff]  ;;  %vm5931_vm15 = vmmov %vm5930_vm13 }
 0x42d   : > { %2680 = vperm.xlu0 %4530, %v740_v37   ;;  %vm5932_vm1 = vmmov %vm5930_vm13 }
 0x42e   : > { %v2950_v7 = vpop.permute.xlu1 %2949  ;;  %vm5933_vm2 = vmmov %vm5932_vm1 }
 0x42f   : > { %4163 = vmatmul.mubr.msk.bf16.vlgmr.msra.gmra.mrb[56].mxu0 %vm861_vm14, %v4620_v6  ;;  %v2946_v55 = vpop.permute.xlu0 %2945  ;;  %v2958_v48 = vsel %vm1021_vm10, %v2948_v27, %v2950_v7  ;;  %v4622_v7 = vld [vmem:[%s5906_s2 + $0x30] sm:$0xff]  }
 0x430   : > { %v2957_v45 = vsel %vm1021_vm10, %v2946_v55, %v2948_v27  ;;  %2971 = vmatprep.subr.bf16.mxu0 %v2958_v48  ;;  %2685 = vperm.xlu1 %4531, %v741_v14  }
 0x431   : > { %2972 = vmatpush1.bf16.msra.mxu0 %v2957_v45  ;;  %2690 = vperm.xlu0 %4530, %v742_v39  }
 0x432   : > { %v2954_v59 = vpop.permute.xlu1 %2953  ;;  %2918 = vmatprep.mubr.bf16.mxu0 %v5922_v28 }
 0x433   : > { %v2956_v17 = vpop.permute.xlu0 %2955 }
 0x434   : > { %2695 = vperm.xlu1 %4531, %v743_v29   ;;  %v2960_v58 = vsel %vm1021_vm10, %v2954_v59, %v2956_v17  ;;  %v4623_v17 = vld [vmem:[%s5906_s2 + $0x38] sm:$0xff]  }
 0x435   : > { %3785 = vperm.xlu0 %4530, %v2810_v60   ;;  %2973 = vmatprep.subr.bf16.mxu0 %v2960_v58 }
 0x436   : > { %v2952_v61 = vpop.permute.xlu1 %2951 }
 0x437   : > { %v2959_v2 = vsel %vm1021_vm10, %v2952_v61, %v2954_v59  ;;  %4164 = vmatmul.mubr.msk.bf16.gmra.mrb[60].mxu0 %vm861_vm14, %v4621_v62  ;;  %v3053_v37 = vpop.permute.xlu0 %3052  ;;  %vm5927_vm10 = vmmov %vm5926_vm7 }
 0x438   : > { %3790 = vperm.xlu1 %4531, %v2811_v8   ;;  %2974 = vmatpush1.bf16.msra.mxu0 %v2959_v2  ;;  %v4624_v2 = vld [vmem:[%s5906_s2 + $0xb0] sm:$0xff]  }
 0x439   : > { %3795 = vperm.xlu0 %4530, %v2812_v46   ;;  %3003 = vmatprep.mubr.bf16.mxu0 %v5922_v28 }
 0x43a   : > { %v3055_v27 = vpop.permute.xlu1 %3054 }
 0x43b   : > { %v3051_v6 = vpop.permute.xlu0 %3050  ;;  %v3063_v14 = vsel %vm5926_vm7, %v3053_v37, %v3055_v27  ;;  %vm5939_vm7 = vmmov %vm5938_vm9 }
 0x43c   : > { %3800 = vperm.xlu1 %4531, %v2813_v42   ;;  %3076 = vmatprep.subr.bf16.mxu0 %v3063_v14  ;;  %v3062_v55 = vsel %vm5927_vm10, %v3051_v6, %v3053_v37  ;;  %vm5940_vm10 = vmmov %vm5939_vm7 }
 0x43e   : > { %v3059_v39 = vpop.permute.xlu1 %3058 }
 0x43f   : > { %4167 = vmatmul.mubr.msk.bf16.vlgmr.msra.gmra.mrb[56].mxu0 %vm861_vm14, %v4622_v7  ;;  %v3061_v48 = vpop.permute.xlu0 %3060 }
 0x440   : > { %3077 = vmatpush1.bf16.msra.mxu0 %v3062_v55  ;;  %v3065_v45 = vsel %vm5928_vm11, %v3059_v39, %v3061_v48  ;;  %3013 = vmatprep.mubr.bf16.mxu0 %v5922_v28  ;;  %v4625_v55 = vld [vmem:[%s5906_s2 + $0xb8] sm:$0xff]   ;;  %vm5941_vm11 = vmmov %vm5939_vm7 }
 0x441   : > { %3078 = vmatprep.subr.bf16.mxu0 %v3065_v45 }
 0x442   : > { %v3057_v29 = vpop.permute.xlu1 %3056 }
 0x443   : > { %v3064_v59 = vsel %vm5929_vm12, %v3057_v29, %v3059_v39  ;;  %v3166_v60 = vpop.permute.xlu0 %3165 }
 0x444   : > { %3079 = vmatpush1.bf16.msra.mxu0 %v3064_v59 }
 0x446   : > { %v3168_v62 = vpop.permute.xlu1 %3167 }
 0x447   : > { %4168 = vmatmul.mubr.msk.bf16.gmra.mrb[60].mxu0 %vm861_vm14, %v4623_v17  ;;  %v3164_v58 = vpop.permute.xlu0 %3163  ;;  %v3176_v8 = vsel %vm5930_vm13, %v3166_v60, %v3168_v62 }
 0x448   : > { %3189 = vmatprep.subr.bf16.mxu0 %v3176_v8  ;;  %3108 = vmatprep.mubr.bf16.mxu0 %v5922_v28  ;;  %v3175_v42 = vsel %vm5931_vm15, %v3164_v58, %v3166_v60  ;;  %v4626_v60 = vld [vmem:[%s5906_s2 + $0xf0] sm:$0xff]   ;;  %v4627_v58 = vld [vmem:[%s5906_s2 + $0xf8] sm:$0xff]  }
 0x44a   : > { %v3172_v61 = vpop.permute.xlu1 %3171 }
 0x44b   : > { %v3174_v46 = vpop.permute.xlu0 %3173 }
 0x44c   : > { %v3178_v6 = vsel %vm5932_vm1, %v3172_v61, %v3174_v46 }
 0x44e   : > { %v3170_v37 = vpop.permute.xlu1 %3169 }
 0x44f   : > { %4175 = vmatmul.mubr.msk.bf16.vlgmr.msra.gmra.mrb[56].mxu0 %vm861_vm14, %v4624_v2  ;;  %v3366_v27 = vpop.permute.xlu0 %3365  ;;  %v3177_v7 = vsel %vm5933_vm2, %v3170_v37, %v3172_v61 }
 0x450   : > { %3190 = vmatpush1.bf16.msra.mxu0 %v3175_v42  ;;  %3118 = vmatprep.mubr.bf16.mxu0 %v5922_v28 }
 0x451   : > { %3191 = vmatprep.subr.bf16.mxu0 %v3178_v6 }
 0x452   : > { %v3368_v14 = vpop.permute.xlu1 %3367 }
 0x453   : > { %v3364_v39 = vpop.permute.xlu0 %3363  ;;  %v3376_v61 = vsel %vm5934_vm3, %v3366_v27, %v3368_v14 }
 0x454   : > { %3192 = vmatpush1.bf16.msra.mxu0 %v3177_v7  ;;  %v3375_v37 = vsel %vm5935_vm0, %v3364_v39, %v3366_v27  ;;  %v4629_v7 = vld [vmem:[%s5906_s2 + $0x138] sm:$0xff]  }
 0x455   : > { %3270 = vmatprep.subr.bf16.mxu0 %v5437_v18 }
 0x456   : > { %v3372_v48 = vpop.permute.xlu1 %3371 }
 0x457   : > { %4176 = vmatmul.mubr.msk.bf16.gmra.mrb[60].mxu0 %vm861_vm14, %v4625_v55  ;;  %v3374_v45 = vpop.permute.xlu0 %3373 }
 0x458   : > { %3221 = vmatprep.mubr.bf16.mxu0 %v5922_v28  ;;  %v3378_v42 = vsel %vm5936_vm6, %v3372_v48, %v3374_v45  ;;  %v4630_v45 = vld [vmem:[%s5906_s2 + $0x170] sm:$0xff]  }
 0x45a   : > { %v3370_v29 = vpop.permute.xlu1 %3369 }
 0x45b   : > { %v3479_v59 = vpop.permute.xlu0 %3478  ;;  %v3377_v6 = vsel %vm5937_vm8, %v3370_v29, %v3372_v48 }
 0x45e   : > { %v3481_v17 = vpop.permute.xlu1 %3480 }
 0x45f   : > { %4183 = vmatmul.mubr.msk.bf16.vlgmr.msra.gmra.mrb[56].mxu0 %vm861_vm14, %v4626_v60  ;;  %v3477_v62 = vpop.permute.xlu0 %3476  ;;  %v3489_v55 = vsel %vm5938_vm9, %v3479_v59, %v3481_v17 }
 0x460   : > { %3271 = vmatpush1.bf16.msra.mxu0 %v5435_v24  ;;  %3231 = vmatprep.mubr.bf16.mxu0 %v5922_v28  ;;  %v3488_v29 = vsel %vm5939_vm7, %v3477_v62, %v3479_v59 }
 0x461   : > { %3272 = vmatprep.subr.bf16.mxu0 %v5447_v26  ;;  %v4628_v26 = vld [vmem:[%s5906_s2 + $0x130] sm:$0xff]  }
 0x462   : > { %v3485_v18 = vpop.permute.xlu1 %3484 }
 0x463   : > { %v3487_v8 = vpop.permute.xlu0 %3486 }
 0x464   : > { %3273 = vmatpush1.bf16.msra.mxu0 %v5443_v36  ;;  %v3491_v17 = vsel %vm5940_vm10, %v3485_v18, %v3487_v8 }
 0x465   : > { %3389 = vmatprep.subr.bf16.mxu0 %v3376_v61 }
 0x466   : > { %v3483_v46 = vpop.permute.xlu1 %3482 }
 0x467   : > { %4184 = vmatmul.mubr.msk.bf16.gmra.mrb[60].mxu0 %vm861_vm14, %v4627_v58  ;;  %v3586_v24 = vpop.permute.xlu0 %3585  ;;  %v3490_v61 = vsel %vm5941_vm11, %v3483_v46, %v3485_v18  ;;  %v4632_v18 = vld [vmem:[%s5906_s2 + $0x1b0] sm:$0xff]  }
 0x468   : > { %3302 = vmatprep.mubr.bf16.mxu0 %v5922_v28 }
 0x46a   : > { %v3588_v2 = vpop.permute.xlu1 %3587 }
 0x46b   : > { %v3584_v36 = vpop.permute.xlu0 %3583  ;;  %v3596_v59 = vsel %vm2276_vm4, %v3586_v24, %v3588_v2 }
 0x46e   : > { %v3592_v14 = vpop.permute.xlu1 %3591 }
 0x46f   : > { %4191 = vmatmul.mubr.msk.bf16.vlgmr.msra.gmra.mrb[56].mxu0 %vm861_vm14, %v4628_v26  ;;  %v3594_v27 = vpop.permute.xlu0 %3593  ;;  %v4631_v26 = vld [vmem:[%s5906_s2 + $0x178] sm:$0xff]  }
 0x470   : > { %3390 = vmatpush1.bf16.msra.mxu0 %v3375_v37  ;;  %3312 = vmatprep.mubr.bf16.mxu0 %v5922_v28 }
 0x471   : > { %3391 = vmatprep.subr.bf16.mxu0 %v3378_v42 }
 0x472   : > { %v3590_v39 = vpop.permute.xlu1 %3589 }
 0x473   : > { %v5767_v48 = vpop.permute.xlu0 %3698 }
 0x474   : > { %3392 = vmatpush1.bf16.msra.mxu0 %v3377_v6  ;;  %v3595_v6 = vsel %vm2276_vm4, %v3584_v36, %v3586_v24 }
 0x475   : > { %3502 = vmatprep.subr.bf16.mxu0 %v3489_v55 }
 0x476   : > { %v3701_v60 = vpop.permute.xlu1 %3700 }
 0x477   : > { %4192 = vmatmul.mubr.msk.bf16.gmra.mrb[60].mxu0 %vm861_vm14, %v4629_v7  ;;  %v5773_v58 = vpop.permute.xlu0 %3696 }
 0x478   : > { %3421 = vmatprep.mubr.bf16.mxu0 %v5922_v28 }
 0x47a   : > { %v5780_v62 = vpop.permute.xlu1 %3704 }
 0x47b   : > { %v5783_v8 = vpop.permute.xlu0 %3706 }
 0x47e   : > { %v5786_v37 = vpop.permute.xlu1 %3702 }
 0x47f   : > { %4199 = vmatmul.mubr.msk.bf16.vlgmr.msra.gmra.mrb[56].mxu0 %vm861_vm14, %v4630_v45 }
 0x480   : > { %3503 = vmatpush1.bf16.msra.mxu0 %v3488_v29  ;;  %3431 = vmatprep.mubr.bf16.mxu0 %v5922_v28 }
 0x481   : > { %3504 = vmatprep.subr.bf16.mxu0 %v3491_v17 }
 0x484   : > { %3505 = vmatpush1.bf16.msra.mxu0 %v3490_v61 }
 0x485   : > { %3609 = vmatprep.subr.bf16.mxu0 %v3596_v59 }
 0x487   : > { %4200 = vmatmul.mubr.msk.bf16.gmra.mrb[60].mxu0 %vm861_vm14, %v4631_v26 }
 0x488   : > { %3534 = vmatprep.mubr.bf16.mxu0 %v5922_v28 }
 0x48c   : > { %v337_v46 = vpop.permute.xlu0 %336 }
 0x48d   : > { %v546_v42 = vadd.f32 %v5321_v19, %v337_v46  ;;  %v548_v2 = vadd.f32 %v5323_v21, %v337_v46  ;;  %v3598_v19 = vsel %vm2276_vm4, %v3592_v14, %v3594_v27  ;;  %v4633_v27 = vld [vmem:[%s5906_s2 + $0x1b8] sm:$0xff]  }
 0x48f   : > { %v612_v7 = vmax.f32 %v546_v42, 0.0  ;;  %v613_v55 = vmax.f32 %v548_v2, 0.0  ;;  %v342_v45 = vpop.permute.xlu1 %341  ;;  %4207 = vmatmul.mubr.msk.bf16.vlgmr.msra.gmra.mrb[56].mxu0 %vm861_vm14, %v4632_v18  ;;  %v3597_v18 = vsel %vm2276_vm4, %v3590_v39, %v3592_v14 }
 0x490   : > { %v550_v29 = vadd.f32 %v5325_v23, %v342_v45  ;;  %v552_v17 = vadd.f32 %v5329_v25, %v342_v45  ;;  %3610 = vmatpush1.bf16.msra.mxu0 %v3595_v6  ;;  %v347_v21 = vpop.permute.xlu0 %346  ;;  %3544 = vmatprep.mubr.bf16.mxu0 %v5922_v28 }
 0x491   : > { %v4231_v24 = vpack.c.bf16 %v613_v55, %v612_v7  ;;  %3611 = vmatprep.subr.bf16.mxu0 %v3598_v19  ;;  %v556_v36 = vadd.f32 %v5337_v31, %v347_v21  ;;  %v558_v61 = vadd.f32 %v5339_v15, %v347_v21  ;;  %v3709_v15 = vsel %vm768_vm5, %v5767_v48, %v3701_v60 }
 0x492   : > { %v614_v26 = vmax.f32 %v550_v29, 0.0  ;;  %v615_v59 = vmax.f32 %v552_v17, 0.0 }
 0x493   : > { %708 = vst [vmem:[%s5799_s7 + $0x60] sm:$0xff] %v4231_v24  ;;  %v616_v23 = vmax.f32 %v556_v36, 0.0  ;;  %v617_v25 = vmax.f32 %v558_v61, 0.0  ;;  %v352_v46 = vpop.permute.xlu1 %351 }
 0x494   : > { %v4232_v42 = vpack.c.bf16 %v615_v59, %v614_v26  ;;  %v560_v2 = vadd.f32 %v5341_v34, %v352_v46  ;;  %v562_v31 = vadd.f32 %v5344_v13, %v352_v46  ;;  %3612 = vmatpush1.bf16.msra.mxu0 %v3597_v18  ;;  %v357_v14 = vpop.permute.xlu0 %356 }
 0x495   : > { %v4233_v39 = vpack.c.bf16 %v617_v25, %v616_v23  ;;  %3722 = vmatprep.subr.bf16.mxu0 %v3709_v15  ;;  %v566_v6 = vadd.f32 %v5355_v40, %v357_v14  ;;  %v568_v7 = vadd.f32 %v5357_v41, %v357_v14 }
 0x496   : > { %709 = vst [vmem:[%s5799_s7 + $0x68] sm:$0xff] %v4232_v42  ;;  %v618_v55 = vmax.f32 %v560_v2, 0.0  ;;  %v619_v45 = vmax.f32 %v562_v31, 0.0  ;;  %v3708_v31 = vsel %vm768_vm5, %v5773_v58, %v5767_v48 }
 0x497   : > { %710 = vst [vmem:[%s5799_s7 + $0x70] sm:$0xff] %v4233_v39  ;;  %v620_v34 = vmax.f32 %v566_v6, 0.0  ;;  %v621_v29 = vmax.f32 %v568_v7, 0.0  ;;  %v362_v13 = vpop.permute.xlu1 %361  ;;  %4208 = vmatmul.mubr.msk.bf16.gmra.mrb[60].mxu0 %vm861_vm14, %v4633_v27 }
 0x498   : > { %v4234_v17 = vpack.c.bf16 %v619_v45, %v618_v55  ;;  %v570_v60 = vadd.f32 %v5359_v43, %v362_v13  ;;  %v572_v19 = vadd.f32 %v5362_v44, %v362_v13  ;;  %v367_v21 = vpop.permute.xlu0 %366  ;;  %3641 = vmatprep.mubr.bf16.mxu0 %v5922_v28  ;;  %v4634_v43 = vld [vmem:[%s5906_s2 + $0x1f0] sm:$0xff]  }
 0x499   : > { %v4235_v40 = vpack.c.bf16 %v621_v29, %v620_v34  ;;  %v576_v41 = vadd.f32 %v5373_v50, %v367_v21  ;;  %v578_v24 = vadd.f32 %v5375_v51, %v367_v21  ;;  %v4635_v29 = vld [vmem:[%s5906_s2 + $0x1f8] sm:$0xff]  }
 0x49a   : > { %711 = vst [vmem:[%s5799_s7 + $0x78] sm:$0xff] %v4234_v17  ;;  %v622_v36 = vmax.f32 %v570_v60, 0.0  ;;  %v623_v61 = vmax.f32 %v572_v19, 0.0 }
 0x49b   : > { %712 = vst [vmem:[%s5799_s7 + $0x80] sm:$0xff] %v4235_v40  ;;  %v624_v26 = vmax.f32 %v576_v41, 0.0  ;;  %v625_v59 = vmax.f32 %v578_v24, 0.0  ;;  %v372_v18 = vpop.permute.xlu1 %371 }
 0x49c   : > { %v4236_v44 = vpack.c.bf16 %v623_v61, %v622_v36  ;;  %v580_v23 = vadd.f32 %v5377_v52, %v372_v18  ;;  %v582_v50 = vadd.f32 %v5380_v53, %v372_v18  ;;  %v377_v25 = vpop.permute.xlu0 %376  ;;  %v3711_v53 = vsel %vm768_vm5, %v5780_v62, %v5783_v8 }
 0x49d   : > { %v4237_v51 = vpack.c.bf16 %v625_v59, %v624_v26  ;;  %v586_v46 = vadd.f32 %v5391_v0, %v377_v25  ;;  %v588_v27 = vadd.f32 %v5393_v3, %v377_v25 }
 0x49e   : > { %713 = vst [vmem:[%s5799_s7 + $0x88] sm:$0xff] %v4236_v44  ;;  %v626_v42 = vmax.f32 %v580_v23, 0.0  ;;  %v627_v2 = vmax.f32 %v582_v50, 0.0 }
 0x49f   : > { %714 = vst [vmem:[%s5799_s7 + $0x90] sm:$0xff] %v4237_v51  ;;  %v628_v15 = vmax.f32 %v586_v46, 0.0  ;;  %v629_v14 = vmax.f32 %v588_v27, 0.0  ;;  %v382_v52 = vpop.permute.xlu1 %381  ;;  %4215 = vmatmul.mubr.msk.bf16.vlgmr.msra.gmra.mrb[56].mxu0 %vm861_vm14, %v4634_v43 }
 0x4a0   : > { %v4238_v0 = vpack.c.bf16 %v627_v2, %v626_v42  ;;  %v590_v3 = vadd.f32 %v5395_v4, %v382_v52  ;;  %v592_v39 = vadd.f32 %v5398_v5, %v382_v52  ;;  %3723 = vmatpush1.bf16.msra.mxu0 %v3708_v31  ;;  %v387_v6 = vpop.permute.xlu0 %386  ;;  %3651 = vmatprep.mubr.bf16.mxu0 %v5922_v28 }
 0x4a1   : > { %v4239_v48 = vpack.c.bf16 %v629_v14, %v628_v15  ;;  %3724 = vmatprep.subr.bf16.mxu0 %v3711_v53  ;;  %v596_v58 = vadd.f32 %v5409_v56, %v387_v6  ;;  %v598_v7 = vadd.f32 %v5411_v9, %v387_v6  ;;  %v3710_v4 = vsel %vm768_vm5, %v5786_v37, %v5780_v62  ;;  %v5942_v14 = vld [vmem:[#allocation3_spill] sm:$0xff] }
 0x4a2   : > { %715 = vst [vmem:[%s5799_s7 + $0x98] sm:$0xff] %v4238_v0  ;;  %v630_v55 = vmax.f32 %v590_v3, 0.0  ;;  %v631_v45 = vmax.f32 %v592_v39, 0.0 }
 0x4a3   : > { %716 = vst [vmem:[%s5799_s7 + $0xa0] sm:$0xff] %v4239_v48  ;;  %v632_v5 = vmax.f32 %v596_v58, 0.0  ;;  %v633_v8 = vmax.f32 %v598_v7, 0.0  ;;  %v392_v34 = vpop.permute.xlu1 %391  ;;  %v4637_v58 = vld [vmem:[%s5906_s2 + $0x238] sm:$0xff]  }
 0x4a4   : > { %v4240_v56 = vpack.c.bf16 %v631_v45, %v630_v55  ;;  %v600_v9 = vadd.f32 %v5413_v10, %v392_v34  ;;  %v602_v13 = vadd.f32 %v5416_v11, %v392_v34  ;;  %3725 = vmatpush1.bf16.msra.mxu0 %v3710_v4  ;;  %v2661_v17 = vpop.permute.xlu0 %2660 }
 0x4a5   : > { %v4241_v60 = vpack.c.bf16 %v633_v8, %v632_v5  ;;  %v2706_v19 = vadd.f32 %v5445_v54, %v2661_v17  ;;  %v2707_v62 = vadd.f32 %v5449_v49, %v2661_v17 }
 0x4a6   : > { %717 = vst [vmem:[%s5799_s7 + $0xa8] sm:$0xff] %v4240_v56  ;;  %v634_v37 = vmax.f32 %v600_v9, 0.0  ;;  %v635_v21 = vmax.f32 %v602_v13, 0.0 }
 0x4a7   : > { %718 = vst [vmem:[%s5799_s7 + $0xb0] sm:$0xff] %v4241_v60  ;;  %v2730_v40 = vmax.f32 %v2706_v19, 0.0  ;;  %v2731_v41 = vmax.f32 %v2707_v62, 0.0  ;;  %v2666_v24 = vpop.permute.xlu1 %2665  ;;  %4216 = vmatmul.mubr.msk.bf16.gmra.mrb[60].mxu0 %vm861_vm14, %v4635_v29 }
 0x4a8   : > { %v4242_v10 = vpack.c.bf16 %v635_v21, %v634_v37  ;;  %v2708_v11 = vadd.f32 %v5451_v22, %v2666_v24  ;;  %v2709_v36 = vadd.f32 %v5455_v33, %v2666_v24  ;;  %v2671_v61 = vpop.permute.xlu0 %2670  ;;  %3754 = vmatprep.mubr.bf16.mxu0 %v5922_v28  ;;  %v4636_v22 = vld [vmem:[%s5906_s2 + $0x230] sm:$0xff]  }
 0x4a9   : > { %v4243_v54 = vpack.c.bf16 %v2731_v41, %v2730_v40  ;;  %v2710_v49 = vadd.f32 %v5465_v38, %v2671_v61  ;;  %v2711_v26 = vadd.f32 %v5467_v47, %v2671_v61 }
 0x4aa   : > { %719 = vst [vmem:[%s5799_s7 + $0xb8] sm:$0xff] %v4242_v10  ;;  %v2732_v59 = vmax.f32 %v2708_v11, 0.0  ;;  %v2733_v18 = vmax.f32 %v2709_v36, 0.0 }
 0x4ab   : > { %2794 = vst [vmem:[%s5799_s7 + $0x20] sm:$0xff] %v4243_v54  ;;  %v2734_v43 = vmax.f32 %v2710_v49, 0.0  ;;  %v2735_v44 = vmax.f32 %v2711_v26, 0.0  ;;  %v2676_v23 = vpop.permute.xlu1 %2675 }
 0x4ac   : > { %v4244_v33 = vpack.c.bf16 %v2733_v18, %v2732_v59  ;;  %v2712_v50 = vadd.f32 %v5472_v63, %v2676_v23  ;;  %v2713_v38 = vadd.f32 %v5475_v57, %v2676_v23  ;;  %v2681_v25 = vpop.permute.xlu0 %2680 }
 0x4ad   : > { %v4245_v47 = vpack.c.bf16 %v2735_v44, %v2734_v43  ;;  %v2714_v51 = vadd.f32 %v5487_v20, %v2681_v25  ;;  %v2715_v46 = vadd.f32 %v5489_v35, %v2681_v25 }
 0x4ae   : > { %2795 = vst [vmem:[%s5799_s7 + $0x28] sm:$0xff] %v4244_v33  ;;  %v2736_v27 = vmax.f32 %v2712_v50, 0.0  ;;  %v2737_v42 = vmax.f32 %v2713_v38, 0.0 }
 0x4af   : > { %2796 = vst [vmem:[%s5799_s7 + $0x30] sm:$0xff] %v4245_v47  ;;  %v2738_v2 = vmax.f32 %v2714_v51, 0.0  ;;  %v2739_v31 = vmax.f32 %v2715_v46, 0.0  ;;  %v2686_v15 = vpop.permute.xlu1 %2685  ;;  %4223 = vmatmul.mubr.msk.bf16.vlgmr.msra.gmra.mrb[56].mxu0 %vm861_vm14, %v4636_v22 }
 0x4b0   : > { %v4246_v63 = vpack.c.bf16 %v2737_v42, %v2736_v27  ;;  %v2716_v57 = vadd.f32 %v5491_v30, %v2686_v15  ;;  %v2717_v52 = vadd.f32 %v5942_v14, %v2686_v15  ;;  %v2691_v53 = vpop.permute.xlu0 %2690  ;;  %3764 = vmatprep.mubr.bf16.mxu0 %v5922_v28 }
 0x4b1   : > { %v4247_v20 = vpack.c.bf16 %v2739_v31, %v2738_v2  ;;  %v2718_v35 = vadd.f32 %v5507_v32, %v2691_v53  ;;  %v2719_v0 = vadd.f32 %v5509_v1, %v2691_v53 }
 0x4b2   : > { %2797 = vst [vmem:[%s5799_s7 + $0x38] sm:$0xff] %v4246_v63  ;;  %v2740_v3 = vmax.f32 %v2716_v57, 0.0  ;;  %v2741_v39 = vmax.f32 %v2717_v52, 0.0 }
 0x4b3   : > { %2798 = vst [vmem:[%s5799_s7 + $0x40] sm:$0xff] %v4247_v20  ;;  %v2742_v6 = vmax.f32 %v2718_v35, 0.0  ;;  %v2743_v48 = vmax.f32 %v2719_v0, 0.0  ;;  %v2696_v30 = vpop.permute.xlu1 %2695 }
 0x4b4   : > { %v4248_v28 = vpack.c.bf16 %v2741_v39, %v2740_v3  ;;  %v2720_v7 = vadd.f32 %v5514_v16, %v2696_v30  ;;  %v2721_v32 = vadd.f32 %v5520_v12, %v2696_v30  ;;  %v3786_v5 = vpop.permute.xlu0 %3785 }
 0x4b5   : > { %v4249_v55 = vpack.c.bf16 %v2743_v48, %v2742_v6 }
 0x4b6   : > { %2799 = vst [vmem:[%s5799_s7 + $0x48] sm:$0xff] %v4248_v28  ;;  %v2744_v1 = vmax.f32 %v2720_v7, 0.0  ;;  %v2745_v45 = vmax.f32 %v2721_v32, 0.0 }
 0x4b7   : > { %2800 = vst [vmem:[%s5799_s7 + $0x50] sm:$0xff] %v4249_v55  ;;  %4224 = vmatmul.mubr.msk.bf16.gmra.mrb[60].mxu0 %vm861_vm14, %v4637_v58  ;;  %v3791_v56 = vpop.permute.xlu1 %3790 }
 0x4b8   : > { %v4250_v4 = vpack.c.bf16 %v2745_v45, %v2744_v1  ;;  %v3796_v40 = vpop.permute.xlu0 %3795 }
 0x4ba   : > { %2801 = vst [vmem:[%s5799_s7 + $0x58] sm:$0xff] %v4250_v4 }
 0x4bb   : > { %v3801_v36 = vpop.permute.xlu1 %3800 }
 0x582   : > { %v3756_v8 = vpop.f32.mrb[56].mxu0 }
 0x583   : > { %v3803_v34 = vadd.f32 %v3786_v5, %v3756_v8  ;;  %v3758_v29 = vpop.f32.mrb[57].mxu0 }
 0x584   : > { %v3804_v9 = vadd.f32 %v3786_v5, %v3758_v29  ;;  %v3760_v13 = vpop.f32.mrb[58].mxu0 }
 0x585   : > { %v3811_v16 = vmax.f32 %v3803_v34, 0.0  ;;  %v3805_v12 = vadd.f32 %v3791_v56, %v3760_v13  ;;  %v3762_v17 = vpop.f32.mrb[59].mxu0 }
 0x586   : > { %v3812_v60 = vmax.f32 %v3804_v9, 0.0  ;;  %v3806_v19 = vadd.f32 %v3791_v56, %v3762_v17 }
 0x587   : > { %v3813_v62 = vmax.f32 %v3805_v12, 0.0 }
 0x588   : > { %v4251_v37 = vpack.c.bf16 %v3812_v60, %v3811_v16  ;;  %v3814_v21 = vmax.f32 %v3806_v19, 0.0 }
 0x58a   : > { %3843 = vst [vmem:[%s5799_s7] sm:$0xff] %v4251_v37  ;;  %v4252_v41 = vpack.c.bf16 %v3814_v21, %v3813_v62  ;;  %v3766_v24 = vpop.f32.mrb[60].mxu0 }
 0x58b   : > { %v3807_v10 = vadd.f32 %v3796_v40, %v3766_v24  ;;  %v3768_v11 = vpop.f32.mrb[61].mxu0 }
 0x58c   : > { %3844 = vst [vmem:[%s5799_s7 + $0x8] sm:$0xff] %v4252_v41  ;;  %v3808_v61 = vadd.f32 %v3796_v40, %v3768_v11  ;;  %v3770_v54 = vpop.f32.mrb[62].mxu0 }
 0x58d   : > { %v3815_v49 = vmax.f32 %v3807_v10, 0.0  ;;  %v3809_v26 = vadd.f32 %v3801_v36, %v3770_v54  ;;  %v3772_v59 = vpop.f32.mrb[63].mxu0 }
 0x58e   : > { %v3816_v18 = vmax.f32 %v3808_v61, 0.0  ;;  %v3810_v43 = vadd.f32 %v3801_v36, %v3772_v59 }
 0x58f   : > { %v3817_v44 = vmax.f32 %v3809_v26, 0.0 }
 0x590   : > { %v4253_v23 = vpack.c.bf16 %v3816_v18, %v3815_v49  ;;  %v3818_v22 = vmax.f32 %v3810_v43, 0.0 }
 0x592   : > { %3845 = vst [vmem:[%s5799_s7 + $0x10] sm:$0xff] %v4253_v23  ;;  %v4254_v33 = vpack.c.bf16 %v3818_v22, %v3817_v44 }
 0x594   : > { %3846 = vst [vmem:[%s5799_s7 + $0x18] sm:$0xff] %v4254_v33 }
 0x595 PF: > { %s14_s15 = sadd.s32 1, %s4644_s15  }
 0x596   : > { %p11_p4 = scmp.ge.s32.totalorder %s14_s15, 4  }
 0x598   :  { %13 = sbr.rel (!%p11_p4) target bundleno = 1 (0x1), region = 74 }

</bundles_post_ra>
